<compile_context>
chip_gen: v7x
topology: tpu7x:2x2x1
jax: 0.10.0
libtpu: 0.0.40
codegen_flags: <defaults>
</compile_context>

<pallas_src>
import jax
import jax.numpy as jnp
from jax.experimental import pallas as pl

B, S, H = 2, 16, 64
NUM_HEADS = 8
HEAD_DIM = H // NUM_HEADS
VOCAB = 50
WEIGHT_SKETCHY = 0.5
WEIGHT_INTENSIVE = 0.5

QKV_BLOCK = 128                       # lane-aligned block per Q/K/V in the fused matmul
OUT_LANES = 128                       # lane-dense packed output width
USED_LANES = 2 * S + 2 + 1 + 1        # start(S) + end(S) + ans(2) + ver(1) + score(1)


def retro_reader_kernel(
    x_ref, am_ref, qm_ref,
    w_enc_ref, b_enc_ref,
    w_qkv_ref, b_qkv_ref, b_qs_ref,
    w_av_ref, b_av_ref,
    w_se_ref, b_se_ref,
    out_ref,
):
    f32 = jnp.float32

    # ---- synthetic encoder stand-in (masked linear + tanh) ------------------
    x2 = x_ref[...] * am_ref[...]                            # (B*S, H)
    seq2 = jnp.tanh(
        jnp.dot(x2, w_enc_ref[...], preferred_element_type=f32) + b_enc_ref[...])

    # ---- fused, lane-aligned Q/K/V projection: one (B*S,H)@(H,3*128) matmul --
    qkv2 = (jnp.dot(seq2, w_qkv_ref[...], preferred_element_type=f32)
            + b_qkv_ref[...])                                # (B*S, 3*128)

    seq3 = seq2.reshape(B, S, H)
    qkv3 = qkv2.reshape(B, S, 3 * QKV_BLOCK)
    qm = qm_ref[...]                                         # (B, S)
    # question mask commutes with the projection; softmax scale already folded
    q3 = qkv3[:, :, 0:H] * qm[:, :, None] + b_qs_ref[...]    # (B, S, H)
    k3 = qkv3[:, :, QKV_BLOCK:QKV_BLOCK + H]                 # (B, S, H)
    v3 = qkv3[:, :, 2 * QKV_BLOCK:2 * QKV_BLOCK + H]         # (B, S, H)

    # ---- 8-head cross attention: 2 batched einsums + ONE fused softmax ------
    # heads folded into the leading batch axis (row h*B + b); axis-0 concat is
    # a pure major-dim stack (no lane relayout).
    qb = jnp.concatenate(
        [q3[:, :, h * HEAD_DIM:(h + 1) * HEAD_DIM] for h in range(NUM_HEADS)], axis=0)
    kb = jnp.concatenate(
        [k3[:, :, h * HEAD_DIM:(h + 1) * HEAD_DIM] for h in range(NUM_HEADS)], axis=0)
    vb = jnp.concatenate(
        [v3[:, :, h * HEAD_DIM:(h + 1) * HEAD_DIM] for h in range(NUM_HEADS)], axis=0)

    s = jnp.einsum('bqd,bkd->bqk', qb, kb,
                   preferred_element_type=f32)               # (B*NH, S, S)
    s = s - jnp.max(s, axis=-1, keepdims=True)
    p = jnp.exp(s)
    p = p * pl.reciprocal(jnp.sum(p, axis=-1, keepdims=True), approx=False)
    ob = jnp.einsum('bqk,bkd->bqd', p, vb,
                    preferred_element_type=f32)              # (B*NH, S, HD)

    # back to (B, S, H) with head-major hidden layout (matches the reference)
    o3 = jnp.concatenate(
        [ob[h * B:(h + 1) * B] for h in range(NUM_HEADS)], axis=-1)  # (B, S, H)

    # ---- fused start/end head (W_o folded in): one (B*S,H)@(H,2) matmul ------
    se2 = (jnp.dot(o3.reshape(B * S, H), w_se_ref[...],
                   preferred_element_type=f32) + b_se_ref[...])      # (B*S, 2)
    se3 = se2.reshape(B, S, 2)
    start = se3[:, :, 0]                                     # (B, S)
    end = se3[:, :, 1]                                       # (B, S)

    # ---- sketchy reading + verifier: fused (H,3) head on CLS token ----------
    cls = seq3[:, 0, :]                                      # (B, H)
    av = (jnp.dot(cls, w_av_ref[...], preferred_element_type=f32)
          + b_av_ref[...])                                   # (B, 3): ans0, ans1, ver
    score_null = av[:, 1:2] - av[:, 0:1]                     # (B, 1)
    verifier = av[:, 2:3]                                    # (B, 1)

    score_has = (jnp.max(start, axis=1, keepdims=True)
                 + jnp.max(end, axis=1, keepdims=True))      # (B, 1)
    final = (WEIGHT_SKETCHY * score_null
             + WEIGHT_INTENSIVE * score_has
             + verifier)                                     # (B, 1)

    # ---- pack outputs: zero-init + static slice stores (no lane concat) -----
    out_ref[...] = jnp.zeros((B, OUT_LANES), f32)
    out_ref[:, 0:S] = start
    out_ref[:, S:2 * S] = end
    out_ref[:, 2 * S:2 * S + 3] = av
    out_ref[:, 2 * S + 3:2 * S + 4] = final


def prepare_kernel_params(params):
    """Host-side algebraic folding / re-layout of the PyTorch-style weights."""
    scale = HEAD_DIM ** -0.5

    def pad_lanes(w):  # (r, c) -> (r, QKV_BLOCK) zero-padded in lanes
        return jnp.pad(w, ((0, 0), (0, QKV_BLOCK - w.shape[1])))

    w_enc_t = params['w_enc'].T                                       # (H, H) in->out
    b_enc = params['b_enc']                                           # (1, H)

    # fused, lane-aligned QKV: scale folded into W_q; q-bias applied after the mask
    w_qkv = jnp.concatenate(
        [pad_lanes(params['w_q'].T * scale),
         pad_lanes(params['w_k'].T),
         pad_lanes(params['w_v'].T)], axis=1)                         # (H, 3*128)
    b_qkv = jnp.concatenate(
        [jnp.zeros((1, QKV_BLOCK), jnp.float32),
         pad_lanes(params['b_k']),
         pad_lanes(params['b_v'])], axis=1)                           # (1, 3*128)
    b_qs = params['b_q'] * scale                                      # (1, H)

    # answerable + verifier heads fused
    w_av = jnp.concatenate([params['w_ans'].T, params['w_ver'].T], axis=1)  # (H, 3)
    b_av = jnp.concatenate([params['b_ans'], params['b_ver']], axis=1)      # (1, 3)

    # fold W_o into the start / end heads:
    #   attended @ w_start.T + b_start == o @ (w_start @ w_o).T + (b_o @ w_start.T + b_start)
    w_se = jnp.concatenate([(params['w_start'] @ params['w_o']).T,
                            (params['w_end'] @ params['w_o']).T], axis=1)   # (H, 2)
    b_se = jnp.concatenate(
        [params['b_o'] @ params['w_start'].T + params['b_start'],
         params['b_o'] @ params['w_end'].T + params['b_end']], axis=1)      # (1, 2)

    return (w_enc_t, b_enc, w_qkv, b_qkv, b_qs, w_av, b_av, w_se, b_se)


def retro_reader_forward(params, input_ids, attention_mask, question_mask):
    # glue: embedding lookup (gather) + flattening stay in plain JAX
    x2 = params['emb'][input_ids].astype(jnp.float32).reshape(B * S, H)
    am2 = attention_mask.astype(jnp.float32).reshape(B * S, 1)
    qm = question_mask.astype(jnp.float32)

    args = (x2, am2, qm) + prepare_kernel_params(params)

    def full_spec(shape):
        nd = len(shape)
        return pl.BlockSpec(shape, lambda i, _nd=nd: (0,) * _nd)

    packed = pl.pallas_call(
        retro_reader_kernel,
        grid=(1,),
        in_specs=[full_spec(a.shape) for a in args],
        out_specs=full_spec((B, OUT_LANES)),
        out_shape=jax.ShapeDtypeStruct((B, OUT_LANES), jnp.float32),
    )(*args)

    # unpack the lane-dense output
    start_logits = packed[:, 0:S]
    end_logits = packed[:, S:2 * S]
    answer_logits = packed[:, 2 * S:2 * S + 2]
    verifier_score = packed[:, 2 * S + 2:2 * S + 3]
    final_score = packed[:, 2 * S + 3:2 * S + 4]

    final_decision = final_score[:, 0] > 0                   # glue: trivial compare
    return final_decision, start_logits, end_logits, answer_logits, verifier_score


def init_params(key):
    keys = jax.random.split(key, 16)

    def w(k, shape, scale=0.1):
        return jax.random.normal(k, shape, jnp.float32) * scale

    return {
        'emb':     w(keys[0], (VOCAB, H)),
        'w_enc':   w(keys[1], (H, H)),
        'b_enc':   w(keys[2], (1, H), 0.02),
        'w_ans':   w(keys[3], (2, H)),
        'b_ans':   w(keys[4], (1, 2), 0.02),
        'w_q':     w(keys[5], (H, H)),
        'b_q':     w(keys[6], (1, H), 0.02),
        'w_k':     w(keys[7], (H, H)),
        'b_k':     w(keys[8], (1, H), 0.02),
        'w_v':     w(keys[9], (H, H)),
        'b_v':     w(keys[10], (1, H), 0.02),
        'w_o':     w(keys[11], (H, H)),
        'b_o':     w(keys[12], (1, H), 0.02),
        'w_start': w(keys[13], (1, H)),
        'b_start': jnp.full((1, 1), 0.01, jnp.float32),
        'w_end':   w(keys[14], (1, H)),
        'b_end':   jnp.full((1, 1), -0.01, jnp.float32),
        'w_ver':   w(keys[15], (1, H)),
        'b_ver':   jnp.zeros((1, 1), jnp.float32),
    }


def reference_forward(params, input_ids, attention_mask, question_mask):
    """Pure-JAX reference mirroring the PyTorch forward semantics."""
    def proj(x, w, b):
        return jnp.einsum('...i,oi->...o', x, w) + b

    x = params['emb'][input_ids].astype(jnp.float32)
    am = attention_mask.astype(jnp.float32)
    qm = question_mask.astype(jnp.float32)

    seq = jnp.tanh(proj(x * am[:, :, None], params['w_enc'], params['b_enc']))
    cls = seq[:, 0, :]
    ans = proj(cls, params['w_ans'], params['b_ans'])
    score_null = ans[:, 1] - ans[:, 0]

    qtok = seq * qm[:, :, None]
    q = proj(qtok, params['w_q'], params['b_q'])
    k = proj(seq, params['w_k'], params['b_k'])
    v = proj(seq, params['w_v'], params['b_v'])
    qh = q.reshape(B, S, NUM_HEADS, HEAD_DIM).transpose(0, 2, 1, 3) * (HEAD_DIM ** -0.5)
    kh = k.reshape(B, S, NUM_HEADS, HEAD_DIM).transpose(0, 2, 1, 3)
    vh = v.reshape(B, S, NUM_HEADS, HEAD_DIM).transpose(0, 2, 1, 3)
    scores = jnp.einsum('bhqd,bhkd->bhqk', qh, kh)
    p = jax.nn.softmax(scores, axis=-1)
    o = jnp.einsum('bhqk,bhkd->bhqd', p, vh).transpose(0, 2, 1, 3).reshape(B, S, H)
    attended = proj(o, params['w_o'], params['b_o'])

    start = proj(attended, params['w_start'], params['b_start'])[:, :, 0]
    end = proj(attended, params['w_end'], params['b_end'])[:, :, 0]
    ver = proj(cls, params['w_ver'], params['b_ver'])
    score_has = start.max(axis=1) + end.max(axis=1)
    final = WEIGHT_SKETCHY * score_null + WEIGHT_INTENSIVE * score_has + ver[:, 0]
    return final > 0, start, end, ans, ver


if __name__ == "__main__":
    key = jax.random.PRNGKey(0)
    pkey, idkey = jax.random.split(key)
    params = init_params(pkey)

    input_ids = jax.random.randint(idkey, (B, S), 0, VOCAB)
    attention_mask = jnp.ones((B, S), jnp.float32).at[1, 12:].set(0.0)
    question_mask = jnp.broadcast_to(
        (jnp.arange(S) < 5).astype(jnp.float32)[None, :], (B, S))

    outs = retro_reader_forward(params, input_ids, attention_mask, question_mask)
    outs = jax.block_until_ready(outs)

    ref = reference_forward(params, input_ids, attention_mask, question_mask)
    names = ["start_logits", "end_logits", "answer_logits", "verifier_score"]
    for name, a, b in zip(names, outs[1:], ref[1:]):
        assert a.shape == b.shape, (name, a.shape, b.shape)
        assert jnp.allclose(a, b, atol=5e-3, rtol=5e-3), (name, a, b)

    print("KERNEL_OK")
</pallas_src>

<mosaic_0001>
module attributes {stable_mosaic.version = 11 : i64} {
  func.func @retro_reader_kernel(%arg0: i32, %arg1: memref<32x64xf32, #tpu.memory_space<vmem>>, %arg2: memref<32x1xf32, #tpu.memory_space<vmem>>, %arg3: memref<2x16xf32, #tpu.memory_space<vmem>>, %arg4: memref<64x64xf32, #tpu.memory_space<vmem>>, %arg5: memref<1x64xf32, #tpu.memory_space<vmem>>, %arg6: memref<64x384xf32, #tpu.memory_space<vmem>>, %arg7: memref<1x384xf32, #tpu.memory_space<vmem>>, %arg8: memref<1x64xf32, #tpu.memory_space<vmem>>, %arg9: memref<64x3xf32, #tpu.memory_space<vmem>>, %arg10: memref<1x3xf32, #tpu.memory_space<vmem>>, %arg11: memref<64x2xf32, #tpu.memory_space<vmem>>, %arg12: memref<1x2xf32, #tpu.memory_space<vmem>>, %arg13: memref<2x128xf32, #tpu.memory_space<vmem>>) attributes {dimension_semantics = [#tpu.dimension_semantics<arbitrary>], iteration_bounds = array<i64: 1>, scalar_prefetch = 0 : i64, scratch_operands = 0 : i64, tpu.core_type = #tpu.core_type<tc>, window_params = [{pipeline_mode = #tpu.pipeline_mode<synchronous>, transform_indices = @transform_0, window_bounds = array<i64: 32, 64>}, {pipeline_mode = #tpu.pipeline_mode<synchronous>, transform_indices = @transform_1, window_bounds = array<i64: 32, 1>}, {pipeline_mode = #tpu.pipeline_mode<synchronous>, transform_indices = @transform_2, window_bounds = array<i64: 2, 16>}, {pipeline_mode = #tpu.pipeline_mode<synchronous>, transform_indices = @transform_3, window_bounds = array<i64: 64, 64>}, {pipeline_mode = #tpu.pipeline_mode<synchronous>, transform_indices = @transform_4, window_bounds = array<i64: 1, 64>}, {pipeline_mode = #tpu.pipeline_mode<synchronous>, transform_indices = @transform_5, window_bounds = array<i64: 64, 384>}, {pipeline_mode = #tpu.pipeline_mode<synchronous>, transform_indices = @transform_6, window_bounds = array<i64: 1, 384>}, {pipeline_mode = #tpu.pipeline_mode<synchronous>, transform_indices = @transform_7, window_bounds = array<i64: 1, 64>}, {pipeline_mode = #tpu.pipeline_mode<synchronous>, transform_indices = @transform_8, window_bounds = array<i64: 64, 3>}, {pipeline_mode = #tpu.pipeline_mode<synchronous>, transform_indices = @transform_9, window_bounds = array<i64: 1, 3>}, {pipeline_mode = #tpu.pipeline_mode<synchronous>, transform_indices = @transform_10, window_bounds = array<i64: 64, 2>}, {pipeline_mode = #tpu.pipeline_mode<synchronous>, transform_indices = @transform_11, window_bounds = array<i64: 1, 2>}, {pipeline_mode = #tpu.pipeline_mode<synchronous>, transform_indices = @transform_12, window_bounds = array<i64: 2, 128>}]} {
    %c0 = arith.constant 0 : index
    %c0_0 = arith.constant 0 : index
    %0 = vector.load %arg1[%c0, %c0_0] : memref<32x64xf32, #tpu.memory_space<vmem>>, vector<32x64xf32>
    %c0_1 = arith.constant 0 : index
    %c0_2 = arith.constant 0 : index
    %1 = vector.load %arg2[%c0_1, %c0_2] : memref<32x1xf32, #tpu.memory_space<vmem>>, vector<32x1xf32>
    %2 = vector.broadcast %1 : vector<32x1xf32> to vector<32x64xf32>
    %3 = arith.mulf %0, %2 : vector<32x64xf32>
    %c0_3 = arith.constant 0 : index
    %c0_4 = arith.constant 0 : index
    %4 = vector.load %arg4[%c0_3, %c0_4] : memref<64x64xf32, #tpu.memory_space<vmem>>, vector<64x64xf32>
    %cst = arith.constant dense<0.000000e+00> : vector<32x64xf32>
    %5 = tpu.matmul %3, %4, %cst {dimension_numbers = #tpu.dot_dimension_numbers<[1], [0], [0], [1], [0, 0, 1, 1], [], []>} : vector<32x64xf32>, vector<64x64xf32>, vector<32x64xf32> -> vector<32x64xf32>
    %c0_5 = arith.constant 0 : index
    %c0_6 = arith.constant 0 : index
    %6 = vector.load %arg5[%c0_5, %c0_6] : memref<1x64xf32, #tpu.memory_space<vmem>>, vector<1x64xf32>
    %7 = vector.broadcast %6 : vector<1x64xf32> to vector<32x64xf32>
    %8 = arith.addf %5, %7 : vector<32x64xf32>
    %9 = math.tanh %8 : vector<32x64xf32>
    %c0_7 = arith.constant 0 : index
    %c0_8 = arith.constant 0 : index
    %10 = vector.load %arg6[%c0_7, %c0_8] : memref<64x384xf32, #tpu.memory_space<vmem>>, vector<64x384xf32>
    %cst_9 = arith.constant dense<0.000000e+00> : vector<32x384xf32>
    %11 = tpu.matmul %9, %10, %cst_9 {dimension_numbers = #tpu.dot_dimension_numbers<[1], [0], [0], [1], [0, 0, 1, 1], [], []>} : vector<32x64xf32>, vector<64x384xf32>, vector<32x384xf32> -> vector<32x384xf32>
    %c0_10 = arith.constant 0 : index
    %c0_11 = arith.constant 0 : index
    %12 = vector.load %arg7[%c0_10, %c0_11] : memref<1x384xf32, #tpu.memory_space<vmem>>, vector<1x384xf32>
    %13 = vector.broadcast %12 : vector<1x384xf32> to vector<32x384xf32>
    %14 = arith.addf %11, %13 : vector<32x384xf32>
    %15 = vector.shape_cast %9 : vector<32x64xf32> to vector<2x16x64xf32>
    %16 = vector.shape_cast %14 : vector<32x384xf32> to vector<2x16x384xf32>
    %c0_12 = arith.constant 0 : index
    %c0_13 = arith.constant 0 : index
    %17 = vector.load %arg3[%c0_12, %c0_13] : memref<2x16xf32, #tpu.memory_space<vmem>>, vector<2x16xf32>
    %18 = vector.extract_strided_slice %16 {offsets = [0, 0, 0], sizes = [2, 16, 64], strides = [1, 1, 1]} : vector<2x16x384xf32> to vector<2x16x64xf32>
    %19 = vector.shape_cast %17 : vector<2x16xf32> to vector<2x16x1xf32>
    %20 = vector.broadcast %19 : vector<2x16x1xf32> to vector<2x16x64xf32>
    %21 = arith.mulf %18, %20 : vector<2x16x64xf32>
    %c0_14 = arith.constant 0 : index
    %c0_15 = arith.constant 0 : index
    %22 = vector.load %arg8[%c0_14, %c0_15] : memref<1x64xf32, #tpu.memory_space<vmem>>, vector<1x64xf32>
    %23 = vector.shape_cast %22 : vector<1x64xf32> to vector<1x1x64xf32>
    %24 = vector.broadcast %23 : vector<1x1x64xf32> to vector<2x16x64xf32>
    %25 = arith.addf %21, %24 : vector<2x16x64xf32>
    %26 = vector.extract_strided_slice %16 {offsets = [0, 0, 128], sizes = [2, 16, 64], strides = [1, 1, 1]} : vector<2x16x384xf32> to vector<2x16x64xf32>
    %27 = vector.extract_strided_slice %16 {offsets = [0, 0, 256], sizes = [2, 16, 64], strides = [1, 1, 1]} : vector<2x16x384xf32> to vector<2x16x64xf32>
    %28 = vector.extract_strided_slice %25 {offsets = [0, 0, 0], sizes = [2, 16, 8], strides = [1, 1, 1]} : vector<2x16x64xf32> to vector<2x16x8xf32>
    %29 = vector.extract_strided_slice %25 {offsets = [0, 0, 8], sizes = [2, 16, 8], strides = [1, 1, 1]} : vector<2x16x64xf32> to vector<2x16x8xf32>
    %30 = vector.extract_strided_slice %25 {offsets = [0, 0, 16], sizes = [2, 16, 8], strides = [1, 1, 1]} : vector<2x16x64xf32> to vector<2x16x8xf32>
    %31 = vector.extract_strided_slice %25 {offsets = [0, 0, 24], sizes = [2, 16, 8], strides = [1, 1, 1]} : vector<2x16x64xf32> to vector<2x16x8xf32>
    %32 = vector.extract_strided_slice %25 {offsets = [0, 0, 32], sizes = [2, 16, 8], strides = [1, 1, 1]} : vector<2x16x64xf32> to vector<2x16x8xf32>
    %33 = vector.extract_strided_slice %25 {offsets = [0, 0, 40], sizes = [2, 16, 8], strides = [1, 1, 1]} : vector<2x16x64xf32> to vector<2x16x8xf32>
    %34 = vector.extract_strided_slice %25 {offsets = [0, 0, 48], sizes = [2, 16, 8], strides = [1, 1, 1]} : vector<2x16x64xf32> to vector<2x16x8xf32>
    %35 = vector.extract_strided_slice %25 {offsets = [0, 0, 56], sizes = [2, 16, 8], strides = [1, 1, 1]} : vector<2x16x64xf32> to vector<2x16x8xf32>
    %36 = tpu.concatenate %28, %29, %30, %31, %32, %33, %34, %35 in 0 : vector<2x16x8xf32>, vector<2x16x8xf32>, vector<2x16x8xf32>, vector<2x16x8xf32>, vector<2x16x8xf32>, vector<2x16x8xf32>, vector<2x16x8xf32>, vector<2x16x8xf32> -> vector<16x16x8xf32>
    %37 = vector.extract_strided_slice %26 {offsets = [0, 0, 0], sizes = [2, 16, 8], strides = [1, 1, 1]} : vector<2x16x64xf32> to vector<2x16x8xf32>
    %38 = vector.extract_strided_slice %26 {offsets = [0, 0, 8], sizes = [2, 16, 8], strides = [1, 1, 1]} : vector<2x16x64xf32> to vector<2x16x8xf32>
    %39 = vector.extract_strided_slice %26 {offsets = [0, 0, 16], sizes = [2, 16, 8], strides = [1, 1, 1]} : vector<2x16x64xf32> to vector<2x16x8xf32>
    %40 = vector.extract_strided_slice %26 {offsets = [0, 0, 24], sizes = [2, 16, 8], strides = [1, 1, 1]} : vector<2x16x64xf32> to vector<2x16x8xf32>
    %41 = vector.extract_strided_slice %26 {offsets = [0, 0, 32], sizes = [2, 16, 8], strides = [1, 1, 1]} : vector<2x16x64xf32> to vector<2x16x8xf32>
    %42 = vector.extract_strided_slice %26 {offsets = [0, 0, 40], sizes = [2, 16, 8], strides = [1, 1, 1]} : vector<2x16x64xf32> to vector<2x16x8xf32>
    %43 = vector.extract_strided_slice %26 {offsets = [0, 0, 48], sizes = [2, 16, 8], strides = [1, 1, 1]} : vector<2x16x64xf32> to vector<2x16x8xf32>
    %44 = vector.extract_strided_slice %26 {offsets = [0, 0, 56], sizes = [2, 16, 8], strides = [1, 1, 1]} : vector<2x16x64xf32> to vector<2x16x8xf32>
    %45 = tpu.concatenate %37, %38, %39, %40, %41, %42, %43, %44 in 0 : vector<2x16x8xf32>, vector<2x16x8xf32>, vector<2x16x8xf32>, vector<2x16x8xf32>, vector<2x16x8xf32>, vector<2x16x8xf32>, vector<2x16x8xf32>, vector<2x16x8xf32> -> vector<16x16x8xf32>
    %46 = vector.extract_strided_slice %27 {offsets = [0, 0, 0], sizes = [2, 16, 8], strides = [1, 1, 1]} : vector<2x16x64xf32> to vector<2x16x8xf32>
    %47 = vector.extract_strided_slice %27 {offsets = [0, 0, 8], sizes = [2, 16, 8], strides = [1, 1, 1]} : vector<2x16x64xf32> to vector<2x16x8xf32>
    %48 = vector.extract_strided_slice %27 {offsets = [0, 0, 16], sizes = [2, 16, 8], strides = [1, 1, 1]} : vector<2x16x64xf32> to vector<2x16x8xf32>
    %49 = vector.extract_strided_slice %27 {offsets = [0, 0, 24], sizes = [2, 16, 8], strides = [1, 1, 1]} : vector<2x16x64xf32> to vector<2x16x8xf32>
    %50 = vector.extract_strided_slice %27 {offsets = [0, 0, 32], sizes = [2, 16, 8], strides = [1, 1, 1]} : vector<2x16x64xf32> to vector<2x16x8xf32>
    %51 = vector.extract_strided_slice %27 {offsets = [0, 0, 40], sizes = [2, 16, 8], strides = [1, 1, 1]} : vector<2x16x64xf32> to vector<2x16x8xf32>
    %52 = vector.extract_strided_slice %27 {offsets = [0, 0, 48], sizes = [2, 16, 8], strides = [1, 1, 1]} : vector<2x16x64xf32> to vector<2x16x8xf32>
    %53 = vector.extract_strided_slice %27 {offsets = [0, 0, 56], sizes = [2, 16, 8], strides = [1, 1, 1]} : vector<2x16x64xf32> to vector<2x16x8xf32>
    %54 = tpu.concatenate %46, %47, %48, %49, %50, %51, %52, %53 in 0 : vector<2x16x8xf32>, vector<2x16x8xf32>, vector<2x16x8xf32>, vector<2x16x8xf32>, vector<2x16x8xf32>, vector<2x16x8xf32>, vector<2x16x8xf32>, vector<2x16x8xf32> -> vector<16x16x8xf32>
    "tpu.trace_start"() <{level = 10 : i32, message = "bqd,bkd->bqk"}> : () -> ()
    %cst_16 = arith.constant dense<0.000000e+00> : vector<16x16x16xf32>
    %55 = tpu.matmul %36, %45, %cst_16 {dimension_numbers = #tpu.dot_dimension_numbers<[2], [2], [1], [1], [0, 0, 0, 1, 1, 1], [0], [0]>} : vector<16x16x8xf32>, vector<16x16x8xf32>, vector<16x16x16xf32> -> vector<16x16x16xf32>
    "tpu.trace_stop"() : () -> ()
    %cst_17 = arith.constant dense<0xFF800000> : vector<16x16xf32>
    %56 = vector.multi_reduction <maximumf>, %55, %cst_17 [2] : vector<16x16x16xf32> to vector<16x16xf32>
    %57 = vector.shape_cast %56 : vector<16x16xf32> to vector<16x16x1xf32>
    %58 = vector.broadcast %57 : vector<16x16x1xf32> to vector<16x16x16xf32>
    %59 = arith.subf %55, %58 : vector<16x16x16xf32>
    %60 = math.exp %59 : vector<16x16x16xf32>
    %cst_18 = arith.constant dense<0.000000e+00> : vector<16x16xf32>
    %61 = vector.multi_reduction <add>, %60, %cst_18 [2] : vector<16x16x16xf32> to vector<16x16xf32>
    %62 = vector.shape_cast %61 : vector<16x16xf32> to vector<16x16x1xf32>
    %63 = tpu.reciprocal %62 : vector<16x16x1xf32> -> vector<16x16x1xf32>
    %64 = vector.broadcast %63 : vector<16x16x1xf32> to vector<16x16x16xf32>
    %65 = arith.mulf %60, %64 : vector<16x16x16xf32>
    "tpu.trace_start"() <{level = 10 : i32, message = "bqk,bkd->bqd"}> : () -> ()
    %cst_19 = arith.constant dense<0.000000e+00> : vector<16x16x8xf32>
    %66 = tpu.matmul %65, %54, %cst_19 {dimension_numbers = #tpu.dot_dimension_numbers<[2], [1], [1], [2], [0, 0, 0, 1, 1, 2], [0], [0]>} : vector<16x16x16xf32>, vector<16x16x8xf32>, vector<16x16x8xf32> -> vector<16x16x8xf32>
    "tpu.trace_stop"() : () -> ()
    %67 = vector.extract_strided_slice %66 {offsets = [0, 0, 0], sizes = [2, 16, 8], strides = [1, 1, 1]} : vector<16x16x8xf32> to vector<2x16x8xf32>
    %68 = vector.extract_strided_slice %66 {offsets = [2, 0, 0], sizes = [2, 16, 8], strides = [1, 1, 1]} : vector<16x16x8xf32> to vector<2x16x8xf32>
    %69 = vector.extract_strided_slice %66 {offsets = [4, 0, 0], sizes = [2, 16, 8], strides = [1, 1, 1]} : vector<16x16x8xf32> to vector<2x16x8xf32>
    %70 = vector.extract_strided_slice %66 {offsets = [6, 0, 0], sizes = [2, 16, 8], strides = [1, 1, 1]} : vector<16x16x8xf32> to vector<2x16x8xf32>
    %71 = vector.extract_strided_slice %66 {offsets = [8, 0, 0], sizes = [2, 16, 8], strides = [1, 1, 1]} : vector<16x16x8xf32> to vector<2x16x8xf32>
    %72 = vector.extract_strided_slice %66 {offsets = [10, 0, 0], sizes = [2, 16, 8], strides = [1, 1, 1]} : vector<16x16x8xf32> to vector<2x16x8xf32>
    %73 = vector.extract_strided_slice %66 {offsets = [12, 0, 0], sizes = [2, 16, 8], strides = [1, 1, 1]} : vector<16x16x8xf32> to vector<2x16x8xf32>
    %74 = vector.extract_strided_slice %66 {offsets = [14, 0, 0], sizes = [2, 16, 8], strides = [1, 1, 1]} : vector<16x16x8xf32> to vector<2x16x8xf32>
    %75 = tpu.concatenate %67, %68, %69, %70, %71, %72, %73, %74 in 2 : vector<2x16x8xf32>, vector<2x16x8xf32>, vector<2x16x8xf32>, vector<2x16x8xf32>, vector<2x16x8xf32>, vector<2x16x8xf32>, vector<2x16x8xf32>, vector<2x16x8xf32> -> vector<2x16x64xf32>
    %76 = vector.shape_cast %75 : vector<2x16x64xf32> to vector<32x64xf32>
    %c0_20 = arith.constant 0 : index
    %c0_21 = arith.constant 0 : index
    %77 = vector.load %arg11[%c0_20, %c0_21] : memref<64x2xf32, #tpu.memory_space<vmem>>, vector<64x2xf32>
    %cst_22 = arith.constant dense<0.000000e+00> : vector<32x2xf32>
    %78 = tpu.matmul %76, %77, %cst_22 {dimension_numbers = #tpu.dot_dimension_numbers<[1], [0], [0], [1], [0, 0, 1, 1], [], []>} : vector<32x64xf32>, vector<64x2xf32>, vector<32x2xf32> -> vector<32x2xf32>
    %c0_23 = arith.constant 0 : index
    %c0_24 = arith.constant 0 : index
    %79 = vector.load %arg12[%c0_23, %c0_24] : memref<1x2xf32, #tpu.memory_space<vmem>>, vector<1x2xf32>
    %80 = vector.broadcast %79 : vector<1x2xf32> to vector<32x2xf32>
    %81 = arith.addf %78, %80 : vector<32x2xf32>
    %82 = vector.shape_cast %81 : vector<32x2xf32> to vector<2x16x2xf32>
    %83 = vector.extract_strided_slice %82 {offsets = [0, 0, 0], sizes = [2, 16, 1], strides = [1, 1, 1]} : vector<2x16x2xf32> to vector<2x16x1xf32>
    %84 = vector.shape_cast %83 : vector<2x16x1xf32> to vector<2x16xf32>
    %85 = vector.extract_strided_slice %82 {offsets = [0, 0, 1], sizes = [2, 16, 1], strides = [1, 1, 1]} : vector<2x16x2xf32> to vector<2x16x1xf32>
    %86 = vector.shape_cast %85 : vector<2x16x1xf32> to vector<2x16xf32>
    %87 = vector.extract_strided_slice %15 {offsets = [0, 0, 0], sizes = [2, 1, 64], strides = [1, 1, 1]} : vector<2x16x64xf32> to vector<2x1x64xf32>
    %88 = vector.shape_cast %87 : vector<2x1x64xf32> to vector<2x64xf32>
    %c0_25 = arith.constant 0 : index
    %c0_26 = arith.constant 0 : index
    %89 = vector.load %arg9[%c0_25, %c0_26] : memref<64x3xf32, #tpu.memory_space<vmem>>, vector<64x3xf32>
    %cst_27 = arith.constant dense<0.000000e+00> : vector<2x3xf32>
    %90 = tpu.matmul %88, %89, %cst_27 {dimension_numbers = #tpu.dot_dimension_numbers<[1], [0], [0], [1], [0, 0, 1, 1], [], []>} : vector<2x64xf32>, vector<64x3xf32>, vector<2x3xf32> -> vector<2x3xf32>
    %c0_28 = arith.constant 0 : index
    %c0_29 = arith.constant 0 : index
    %91 = vector.load %arg10[%c0_28, %c0_29] : memref<1x3xf32, #tpu.memory_space<vmem>>, vector<1x3xf32>
    %92 = vector.broadcast %91 : vector<1x3xf32> to vector<2x3xf32>
    %93 = arith.addf %90, %92 : vector<2x3xf32>
    %94 = vector.extract_strided_slice %93 {offsets = [0, 1], sizes = [2, 1], strides = [1, 1]} : vector<2x3xf32> to vector<2x1xf32>
    %95 = vector.extract_strided_slice %93 {offsets = [0, 0], sizes = [2, 1], strides = [1, 1]} : vector<2x3xf32> to vector<2x1xf32>
    %96 = arith.subf %94, %95 : vector<2x1xf32>
    %97 = vector.extract_strided_slice %93 {offsets = [0, 2], sizes = [2, 1], strides = [1, 1]} : vector<2x3xf32> to vector<2x1xf32>
    %cst_30 = arith.constant dense<0xFF800000> : vector<2xf32>
    %98 = vector.multi_reduction <maximumf>, %84, %cst_30 [1] : vector<2x16xf32> to vector<2xf32>
    %99 = vector.shape_cast %98 : vector<2xf32> to vector<2x1xf32>
    %cst_31 = arith.constant dense<0xFF800000> : vector<2xf32>
    %100 = vector.multi_reduction <maximumf>, %86, %cst_31 [1] : vector<2x16xf32> to vector<2xf32>
    %101 = vector.shape_cast %100 : vector<2xf32> to vector<2x1xf32>
    %102 = arith.addf %99, %101 : vector<2x1xf32>
    %cst_32 = arith.constant 5.000000e-01 : f32
    %103 = vector.broadcast %cst_32 : f32 to vector<2x1xf32>
    %104 = arith.mulf %103, %96 : vector<2x1xf32>
    %cst_33 = arith.constant 5.000000e-01 : f32
    %105 = vector.broadcast %cst_33 : f32 to vector<2x1xf32>
    %106 = arith.mulf %105, %102 : vector<2x1xf32>
    %107 = arith.addf %104, %106 : vector<2x1xf32>
    %108 = arith.addf %107, %97 : vector<2x1xf32>
    %cst_34 = arith.constant 0.000000e+00 : f32
    %109 = vector.broadcast %cst_34 : f32 to vector<2x128xf32>
    %c0_35 = arith.constant 0 : index
    %c0_36 = arith.constant 0 : index
    %110 = vector.load %arg13[%c0_35, %c0_36] : memref<2x128xf32, #tpu.memory_space<vmem>>, vector<2x128xf32>
    tpu.vector_store %arg13[%c0_35, %c0_36], %109 {strides = array<i32>} : memref<2x128xf32, #tpu.memory_space<vmem>>, vector<2x128xf32>,
    %c0_37 = arith.constant 0 : index
    %c0_38 = arith.constant 0 : index
    %111 = vector.load %arg13[%c0_37, %c0_38] : memref<2x128xf32, #tpu.memory_space<vmem>>, vector<2x16xf32>
    tpu.vector_store %arg13[%c0_37, %c0_38], %84 {strides = array<i32>} : memref<2x128xf32, #tpu.memory_space<vmem>>, vector<2x16xf32>,
    %c0_39 = arith.constant 0 : index
    %c16 = arith.constant 16 : index
    %112 = vector.load %arg13[%c0_39, %c16] : memref<2x128xf32, #tpu.memory_space<vmem>>, vector<2x16xf32>
    tpu.vector_store %arg13[%c0_39, %c16], %86 {strides = array<i32>} : memref<2x128xf32, #tpu.memory_space<vmem>>, vector<2x16xf32>,
    %c0_40 = arith.constant 0 : index
    %c32 = arith.constant 32 : index
    %113 = vector.load %arg13[%c0_40, %c32] : memref<2x128xf32, #tpu.memory_space<vmem>>, vector<2x3xf32>
    tpu.vector_store %arg13[%c0_40, %c32], %93 {strides = array<i32>} : memref<2x128xf32, #tpu.memory_space<vmem>>, vector<2x3xf32>,
    %c0_41 = arith.constant 0 : index
    %c35 = arith.constant 35 : index
    %114 = vector.load %arg13[%c0_41, %c35] : memref<2x128xf32, #tpu.memory_space<vmem>>, vector<2x1xf32>
    tpu.vector_store %arg13[%c0_41, %c35], %108 {strides = array<i32>} : memref<2x128xf32, #tpu.memory_space<vmem>>, vector<2x1xf32>,
    return
  }
  func.func @transform_0(%arg0: i32) -> (i32, i32) {
    %c0_i32 = arith.constant 0 : i32
    %c0_i32_0 = arith.constant 0 : i32
    %c0_i32_1 = arith.constant 0 : i32
    return %c0_i32, %c0_i32_0 : i32, i32
  }
  func.func @transform_1(%arg0: i32) -> (i32, i32) {
    %c0_i32 = arith.constant 0 : i32
    %c0_i32_0 = arith.constant 0 : i32
    %c0_i32_1 = arith.constant 0 : i32
    return %c0_i32, %c0_i32_0 : i32, i32
  }
  func.func @transform_2(%arg0: i32) -> (i32, i32) {
    %c0_i32 = arith.constant 0 : i32
    %c0_i32_0 = arith.constant 0 : i32
    %c0_i32_1 = arith.constant 0 : i32
    return %c0_i32, %c0_i32_0 : i32, i32
  }
  func.func @transform_3(%arg0: i32) -> (i32, i32) {
    %c0_i32 = arith.constant 0 : i32
    %c0_i32_0 = arith.constant 0 : i32
    %c0_i32_1 = arith.constant 0 : i32
    return %c0_i32, %c0_i32_0 : i32, i32
  }
  func.func @transform_4(%arg0: i32) -> (i32, i32) {
    %c0_i32 = arith.constant 0 : i32
    %c0_i32_0 = arith.constant 0 : i32
    %c0_i32_1 = arith.constant 0 : i32
    return %c0_i32, %c0_i32_0 : i32, i32
  }
  func.func @transform_5(%arg0: i32) -> (i32, i32) {
    %c0_i32 = arith.constant 0 : i32
    %c0_i32_0 = arith.constant 0 : i32
    %c0_i32_1 = arith.constant 0 : i32
    return %c0_i32, %c0_i32_0 : i32, i32
  }
  func.func @transform_6(%arg0: i32) -> (i32, i32) {
    %c0_i32 = arith.constant 0 : i32
    %c0_i32_0 = arith.constant 0 : i32
    %c0_i32_1 = arith.constant 0 : i32
    return %c0_i32, %c0_i32_0 : i32, i32
  }
  func.func @transform_7(%arg0: i32) -> (i32, i32) {
    %c0_i32 = arith.constant 0 : i32
    %c0_i32_0 = arith.constant 0 : i32
    %c0_i32_1 = arith.constant 0 : i32
    return %c0_i32, %c0_i32_0 : i32, i32
  }
  func.func @transform_8(%arg0: i32) -> (i32, i32) {
    %c0_i32 = arith.constant 0 : i32
    %c0_i32_0 = arith.constant 0 : i32
    %c0_i32_1 = arith.constant 0 : i32
    return %c0_i32, %c0_i32_0 : i32, i32
  }
  func.func @transform_9(%arg0: i32) -> (i32, i32) {
    %c0_i32 = arith.constant 0 : i32
    %c0_i32_0 = arith.constant 0 : i32
    %c0_i32_1 = arith.constant 0 : i32
    return %c0_i32, %c0_i32_0 : i32, i32
  }
  func.func @transform_10(%arg0: i32) -> (i32, i32) {
    %c0_i32 = arith.constant 0 : i32
    %c0_i32_0 = arith.constant 0 : i32
    %c0_i32_1 = arith.constant 0 : i32
    return %c0_i32, %c0_i32_0 : i32, i32
  }
  func.func @transform_11(%arg0: i32) -> (i32, i32) {
    %c0_i32 = arith.constant 0 : i32
    %c0_i32_0 = arith.constant 0 : i32
    %c0_i32_1 = arith.constant 0 : i32
    return %c0_i32, %c0_i32_0 : i32, i32
  }
  func.func @transform_12(%arg0: i32) -> (i32, i32) {
    %c0_i32 = arith.constant 0 : i32
    %c0_i32_0 = arith.constant 0 : i32
    %c0_i32_1 = arith.constant 0 : i32
    return %c0_i32, %c0_i32_0 : i32, i32
  }
}

</mosaic_0001>

<bundles_post_ra>
// kernel: tpu_custom_call.1
= control target key start
LH: loop header
LB: loop body
LE: loop exit
PB: predicated region body
PF: predicated region fallthrough
CT: control target
= control target key end

     0   :  { %17 = vsyncpa [#allocation3], 0  ;;  %s6276_s0 = inlined_call_operand.vmem [shape: f32[32,64], index: 0, kind: input, shape index: {}]   ;;  %s6277_s1 = inlined_call_operand.vmem [shape: f32[32,1], index: 1, kind: input, shape index: {}]   ;;  %s6278_s2 = inlined_call_operand.vmem [shape: f32[2,16], index: 2, kind: input, shape index: {}]   ;;  %s6279_s3 = inlined_call_operand.vmem [shape: f32[64,64], index: 3, kind: input, shape index: {}]   ;;  %s6280_s4 = inlined_call_operand.vmem [shape: f32[1,64], index: 4, kind: input, shape index: {}]   ;;  %s6281_s5 = inlined_call_operand.hbm [shape: f32[64,384], index: 5, kind: input, shape index: {}]   ;;  %s6282_s6 = inlined_call_operand.vmem [shape: f32[1,384], index: 6, kind: input, shape index: {}]   ;;  %s6283_s7 = inlined_call_operand.vmem [shape: f32[1,64], index: 7, kind: input, shape index: {}]   ;;  %s6284_s8 = inlined_call_operand.vmem [shape: f32[64,3], index: 8, kind: input, shape index: {}]   ;;  %s6285_s9 = inlined_call_operand.vmem [shape: f32[1,3], index: 9, kind: input, shape index: {}]   ;;  %s6286_s10 = inlined_call_operand.vmem [shape: f32[64,2], index: 10, kind: input, shape index: {}]   ;;  %s6287_s11 = inlined_call_operand.vmem [shape: f32[1,2], index: 11, kind: input, shape index: {}]   ;;  %s6288_s12 = inlined_call_operand.hbm [shape: f32[2,128], index: 12, kind: output, shape index: {}]  }
   0x1   :  { %18 = vsyncpa [#allocation4], 0  ;;  %s5340_s21 = smov [#allocation2]   ;;  %s5292_s25 = scalar_lea.hbm %s6281_s5, 3072 }
   0x2   :  { %s34_s22 = sshll.u32 %s5340_s21, 4  ;;  %p5293_p0 = scmp.ne.s32.totalorder %s6281_s5, %s5292_s25  ;;  %s35_s22 = int_to_ptr.vmem [resolvable:$true] %s34_s22 }
   0x3   :  { %p5296_p1 = scmp.lt.u32.totalorder %s5292_s25, %s6281_s5 }
   0x5   :  { %p5298_p2 = pnand %p5296_p1, %p5293_p0 }
   0x7   :  { %5301 = shalt.err (!%p5298_p2)
}
   0x8   :  { %s5302_s30 = scalar_lea.vmem %s35_s22, 3072  ;;  %p5307_p4 = scmp.lt.s32.totalorder %s35_s22, %s35_s22 }
   0x9   :  { %p5303_p3 = scmp.ne.s32.totalorder %s35_s22, %s5302_s30  ;;  %p5308_p5 = scmp.lt.s32.totalorder %s5302_s30, %s5302_s30 }
   0xb   :  { %p5309_p6 = por %p5308_p5, %p5307_p4 }
   0xd   :  { %p5310_p7 = pnand %p5309_p6, %p5303_p3 }
   0xf   :  { %5313 = shalt.err (!%p5310_p7)
}
  0x10   :  { %s5341_s13 = smov 384   ;;  %s5342_s14 = smov 24  }
  0x11   :  { %40 = dma.hbm_to_vmem [thread:$0]  %s6281_s5, 3072, %s35_s22, [#allocation3], %s5341_s13, %s5341_s13, %s5342_s14  }
  0x12   :  { %5336 = dma.done.wait [#allocation3], 3072  }
  0x13   :  { %5337 = vsyncadd [#allocation3], 4294964224  ;;  %v5343_v0 = vmov 0   ;;  %v60_v1 = vld [vmem:[%s6277_s1] sm:$0xff]  ;;  %v62_v2 = vld [vmem:[%s6277_s1 + $0x10] sm:$0xff]  ;;  %vm103_vm0 = vcmask 523264  }
  0x14   :  { %5008 = vset.pattern.permute.xlu0 %v5343_v0  ;;  %5009 = vset.pattern.permute.xlu1 %v5343_v0  ;;  %v61_v3 = vld [vmem:[%s6277_s1 + $0x8] sm:$0xff]  ;;  %v88_v4 = vld [vmem:[%s6279_s3] sm:$0xff]  ;;  %v63_v6 = vld [vmem:[%s6277_s1 + $0x18] sm:$0xff]  ;;  %v5344_v63 = vmov 0.0   ;;  %vm3929_vm1 = vcmask 1041409   ;;  %vm678_vm2 = vcmask 64512  }
  0x15   :  { %66 = vperm.xlu0 %5008, %v60_v1   ;;  %76 = vperm.xlu1 %5009, %v62_v2   ;;  %v89_v5 = vld [vmem:[%s6279_s3 + $0x8] sm:$0xff]  ;;  %v90_v8 = vld [vmem:[%s6279_s3 + $0x10] sm:$0xff]  ;;  %v91_v9 = vld [vmem:[%s6279_s3 + $0x18] sm:$0xff]  ;;  %4095 = vst [vmem:[#allocation5] sm:$0x3] %v5344_v63  ;;  %s5347_s16 = smov 104  }
  0x16   :  { %v4747_v7 = vpack.c.bf16 %v89_v5, %v88_v4  ;;  %v4751_v10 = vpack.c.bf16 %v91_v9, %v90_v8  ;;  %v92_v11 = vld [vmem:[%s6279_s3 + $0x20] sm:$0xff]  ;;  %v93_v12 = vld [vmem:[%s6279_s3 + $0x28] sm:$0xff]  ;;  %v94_v14 = vld [vmem:[%s6279_s3 + $0x30] sm:$0xff]  ;;  %322 = vmatprep.mubr.f32.mxu1 %v5344_v63  ;;  %s5348_s17 = smov 96   ;;  %s5349_s18 = smov 88   ;;  %vm2007_vm4 = vcmask 130048  }
  0x17   :  { %v4755_v13 = vpack.c.bf16 %v93_v12, %v92_v11  ;;  %v95_v15 = vld [vmem:[%s6279_s3 + $0x38] sm:$0xff]  ;;  %v206_v17 = vld [vmem:[#allocation2 + $0x8] sm:$0xff]  ;;  %v209_v18 = vld [vmem:[#allocation2 + $0x20] sm:$0xff]  ;;  %s5350_s1 = smov 80   ;;  %s5351_s19 = smov 72   ;;  %vm5353_vm5 = vmmov 0  }
  0x18   :  { %4748 = vmatprep.subr.bf16.mxu0 %v4747_v7  ;;  %v4759_v16 = vpack.c.bf16 %v95_v15, %v94_v14  ;;  %v4763_v19 = vpack.c.bf16 %v209_v18, %v206_v17  ;;  %v56_v20 = vld [vmem:[%s6276_s0] sm:$0xff]  ;;  %v58_v24 = vld [vmem:[%s6276_s0 + $0x10] sm:$0xff]  ;;  %v57_v25 = vld [vmem:[%s6276_s0 + $0x8] sm:$0xff]  ;;  %s5354_s13 = smov 8   ;;  %s5356_s15 = smov 32   ;;  %vm3776_vm6 = vcmask 195584  }
  0x19   :  { %71 = vperm.xlu0 %5008, %v61_v3   ;;  %81 = vperm.xlu1 %5009, %v63_v6   ;;  %v59_v29 = vld [vmem:[%s6276_s0 + $0x18] sm:$0xff]  ;;  %v205_v32 = vld [vmem:[#allocation2] sm:$0xff]  ;;  %v207_v34 = vld [vmem:[#allocation2 + $0x10] sm:$0xff]  ;;  %v231_v3 = vlaneseq  ;;  %s5358_s27 = smov 48   ;;  %s5359_s0 = smov 56   ;;  %vm3781_vm7 = vcmask 261120  }
  0x1a   :  { %4750 = vmatpush3.bf16.msra.mxu0 %v4747_v7  ;;  %4764 = vmatprep.subr.bf16.mxu1 %v4763_v19  ;;  %v208_v33 = vld [vmem:[#allocation2 + $0x18] sm:$0xff]  ;;  %v210_v36 = vld [vmem:[#allocation2 + $0x28] sm:$0xff]  ;;  %v215_v39 = vld [vmem:[#allocation2 + $0x50] sm:$0xff]  ;;  %vm3786_vm8 = vcmask 326656   ;;  %vm3791_vm9 = vcmask 392192   ;;  %vm3796_vm10 = vcmask 457728  }
  0x1b   :  { %4752 = vmatprep.subr.bf16.mxu0 %v4751_v10  ;;  %v4765_v35 = vpack.c.bf16 %v208_v33, %v205_v32  ;;  %v4779_v37 = vpack.c.bf16 %v210_v36, %v207_v34  ;;  %v212_v38 = vld [vmem:[#allocation2 + $0x38] sm:$0xff]  ;;  %v211_v41 = vld [vmem:[#allocation2 + $0x30] sm:$0xff]  ;;  %v214_v42 = vld [vmem:[#allocation2 + $0x48] sm:$0xff]  ;;  %v5500_v4 = vshrl.u32 %v231_v3, 7  ;;  %vm4035_vm11 = vcmask 130112   ;;  %s5361_s30 = smov 127  }
  0x1c   :  { %v4767_v40 = vpack.c.bf16 %v215_v39, %v212_v38  ;;  %v213_v43 = vld [vmem:[#allocation2 + $0x40] sm:$0xff]  ;;  %v4769_v44 = vpack.c.bf16 %v214_v42, %v211_v41  ;;  %v216_v45 = vld [vmem:[#allocation2 + $0x58] sm:$0xff]  ;;  %v218_v47 = vld [vmem:[#allocation2 + $0x68] sm:$0xff]  ;;  %vm4048_vm12 = vcmask 123904   ;;  %vm4107_vm13 = vcmask 261312  }
  0x1d   :  { %4766 = vmatpush1.bf16.msra.mxu1 %v4765_v35  ;;  %v4783_v46 = vpack.c.bf16 %v216_v45, %v213_v43  ;;  %v221_v48 = vld [vmem:[#allocation2 + $0x80] sm:$0xff]  ;;  %v220_v51 = vld [vmem:[#allocation2 + $0x78] sm:$0xff]  ;;  %v219_v52 = vld [vmem:[#allocation2 + $0x70] sm:$0xff]  ;;  %v233_v6 = vsub.s32 0, %v5500_v4  ;;  %v237_v7 = vsub.s32 1, %v5500_v4  ;;  %vm4120_vm14 = vcmask 255104  }
  0x1e   :  { %4754 = vmatpush3.bf16.msra.mxu0 %v4751_v10  ;;  %4768 = vmatprep.subr.bf16.mxu1 %v4767_v40  ;;  %v4771_v49 = vpack.c.bf16 %v221_v48, %v218_v47  ;;  %v217_v50 = vld [vmem:[#allocation2 + $0x60] sm:$0xff]  ;;  %v222_v54 = vld [vmem:[#allocation2 + $0x88] sm:$0xff]  ;;  %v224_v56 = vld [vmem:[#allocation2 + $0x98] sm:$0xff]  ;;  %vm4125_vm15 = vcmask 279808  }
  0x1f   :  { %4756 = vmatprep.subr.bf16.mxu0 %v4755_v13  ;;  %v4773_v53 = vpack.c.bf16 %v220_v51, %v217_v50  ;;  %v4787_v55 = vpack.c.bf16 %v222_v54, %v219_v52  ;;  %v227_v57 = vld [vmem:[#allocation2 + $0xb0] sm:$0xff]  ;;  %v226_v60 = vld [vmem:[#allocation2 + $0xa8] sm:$0xff]  ;;  %v225_v61 = vld [vmem:[#allocation2 + $0xa0] sm:$0xff] }
  0x20   :  { %v223_v58 = vld [vmem:[#allocation2 + $0x90] sm:$0xff]  ;;  %v4775_v59 = vpack.c.bf16 %v227_v57, %v224_v56  ;;  %v228_v62 = vld [vmem:[#allocation2 + $0xb8] sm:$0xff]  ;;  %v432_v5 = vld [vmem:[%s6278_s2] sm:$0x3]  ;;  %s5362_s2 = smov 1  }
  0x21   :  { %4770 = vmatpush1.bf16.msra.mxu1 %v4769_v44  ;;  %v4777_v1 = vpack.c.bf16 %v226_v60, %v223_v58  ;;  %v4791_v2 = vpack.c.bf16 %v228_v62, %v225_v61  ;;  %v436_v8 = vrot.slane %v432_v5, %v233_v6  ;;  %v447_v9 = vrot.slane %v432_v5, %v237_v7  ;;  %v4148_v10 = vld [vmem:[%s6280_s4] ss:$0 sm:$0xff]  ;;  %vm5541_vm3 = vmpackc.low %vm678_vm2, %vm678_vm2  ;;  %s5364_s4 = smov [#allocation5]  }
  0x22   :  { %4758 = vmatpush3.bf16.msra.mxu0 %v4755_v13  ;;  %4772 = vmatprep.subr.bf16.mxu1 %v4771_v49 }
  0x23   :  { %4760 = vmatprep.subr.bf16.mxu0 %v4759_v16  ;;  %438 = vbcast.lane.b32.xlu0 %v436_v8, 256 }
  0x24   :  { %442 = vbcast.lane.b32.xlu1 %v436_v8, 264 }
  0x25   :  { %4774 = vmatpush1.bf16.msra.mxu1 %v4773_v53 }
  0x26   :  { %4762 = vmatpush3.bf16.msra.mxu0 %v4759_v16  ;;  %4776 = vmatprep.subr.bf16.mxu1 %v4775_v59 }
  0x27   :  { %4780 = vmatprep.subr.bf16.mxu0 %v4779_v37  ;;  %449 = vbcast.lane.b32.xlu0 %v447_v9, 256 }
  0x28   :  { %453 = vbcast.lane.b32.xlu1 %v447_v9, 264 }
  0x29   :  { %4778 = vmatpush1.bf16.msra.mxu1 %v4777_v1 }
  0x94   :  { %v67_v21 = vpop.permute.xlu0 %66  ;;  %v77_v22 = vpop.permute.xlu1 %76 }
  0x95   :  { %v84_v23 = vmul.f32 %v67_v21, %v56_v20  ;;  %v86_v26 = vmul.f32 %v77_v22, %v58_v24 }
  0x97   :  { %4454 = vmatprep.mubr.msk.f32.mxu0 %vm103_vm0, %v84_v23 }
  0x98   :  { %v72_v27 = vpop.permute.xlu0 %71  ;;  %v82_v28 = vpop.permute.xlu1 %81 }
  0x99   :  { %v85_v30 = vmul.f32 %v72_v27, %v57_v25  ;;  %v87_v31 = vmul.f32 %v82_v28, %v59_v29  ;;  %v229_v25 = vld [vmem:[%s6282_s6] sm:$0x7]  ;;  %s5345_s6 = smov 120  }
  0x9a   :  { %v234_v27 = vrot.slane %v229_v25, %v233_v6  ;;  %v238_v28 = vrot.slane %v229_v25, %v237_v7 }
  0x9b   :  { %4455 = vmatmul.mubr.msk.f32.vlgmr.msra.gmra.mrb[0].mxu0 %vm103_vm0, %v85_v30 }
  0x9c   :  { %4457 = vmatprep.mubr.msk.f32.mxu0 %vm103_vm0, %v86_v26  ;;  %4782 = vmatpush3.bf16.msra.mxu0 %v4779_v37  ;;  %v241_v26 = vsub.s32 2, %v5500_v4  ;;  %v4161_v37 = vld [vmem:[%s6283_s7] ss:$0 sm:$0xff]  ;;  %v443_v48 = vpop.permute.xlu1 %442  ;;  %s5346_s7 = smov 112  }
  0x9d   :  { %4784 = vmatprep.subr.bf16.mxu0 %v4783_v46 }
  0x9e   :  { %v242_v29 = vrot.slane %v229_v25, %v241_v26 }
  0x9f   :  { %4458 = vmatmul.mubr.msk.f32.gmra.mrb[2].mxu0 %vm103_vm0, %v87_v31  ;;  %v439_v31 = vpop.permute.xlu0 %438 }
  0xa0   :  { %4786 = vmatpush3.bf16.msra.mxu0 %v4783_v46 }
  0xa1   :  { %4788 = vmatprep.subr.bf16.mxu0 %v4787_v55 }
  0xa3   :  { %v450_v56 = vpop.permute.xlu0 %449 }
  0xa4   :  { %4790 = vmatpush3.bf16.msra.mxu0 %v4787_v55 }
  0xa5   :  { %4792 = vmatprep.subr.bf16.mxu0 %v4791_v2 }
  0xa8   :  { %4794 = vmatpush3.bf16.msra.mxu0 %v4791_v2 }
 0x16e   :  { %v4456_v11 = vpop.f32.mrb[0].mxu0 }
 0x16f   :  { %v188_v12 = vadd.f32 %v4456_v11, %v4148_v10  ;;  %v182_v13 = vpop.f32.mrb[1].mxu0 }
 0x170   :  { %v183_v14 = vadd.f32 %v4148_v10, %v182_v13  ;;  %v454_v13 = vpop.permute.xlu1 %453 }
 0x172   :  { %5156 = vtanh.f32 %v183_v14  ;;  %v4459_v15 = vpop.f32.mrb[2].mxu0 }
 0x173   :  { %5158 = vtanh.f32 %v188_v12  ;;  %v198_v16 = vadd.f32 %v4459_v15, %v4148_v10  ;;  %v192_v17 = vpop.f32.mrb[3].mxu0 }
 0x174   :  { %v193_v18 = vadd.f32 %v4148_v10, %v192_v17 }
 0x175   :  { %5160 = vtanh.f32 %v198_v16 }
 0x176   :  { %5162 = vtanh.f32 %v193_v18 }
 0x17c   :  { %v5157_v19 = vpop.eup %5156 }
 0x17d   :  { %v5159_v20 = vpop.eup %5158  ;;  %4153 = vmatmul.mubr.msk.f32.vlgmr.msra.gmra.mrb[0].mxu1 %vm103_vm0, %v5157_v19  ;;  %4476 = vmatprep.mubr.msk.f32.mxu0 %vm103_vm0, %v5157_v19 }
 0x17e   :  { %4477 = vmatmul.mubr.msk.f32.vlgmr.msra.gmra.mrb[4].mxu0 %vm103_vm0, %v5159_v20  ;;  %328 = vmatprep.mubr.f32.mxu1 %v5344_v63 }
 0x17f   :  { %v5161_v21 = vpop.eup %5160 }
 0x180   :  { %v5163_v22 = vpop.eup %5162 }
 0x181   :  { %4154 = vmatmul.mubr.msk.f32.gmra.mrb[2].mxu1 %vm103_vm0, %v5159_v20  ;;  %4479 = vmatprep.mubr.msk.f32.mxu0 %vm103_vm0, %v5163_v22  ;;  %v3928_v23 = vrot.slane %v5163_v22, 7 }
 0x182   :  { %334 = vmatprep.mubr.f32.mxu1 %v5344_v63  ;;  %4480 = vmatmul.mubr.msk.f32.gmra.mrb[6].mxu0 %vm103_vm0, %v5161_v21 }
 0x183   :  { %v5519_v24 = vsel %vm3929_vm1, %v3928_v23, %v5157_v19 }
 0x185   :  { %4155 = vmatmul.mubr.msk.f32.gmra.mrb[4].mxu1 %vm103_vm0, %v5163_v22 }
 0x186   :  { %340 = vmatprep.mubr.f32.mxu1 %v5344_v63 }
 0x189   :  { %4156 = vmatmul.mubr.msk.f32.gmra.mrb[6].mxu1 %vm103_vm0, %v5161_v21 }
 0x250   :  { %v324_v30 = vpop.f32.mrb[0].mxu1 }
 0x251   :  { %v325_v32 = vadd.f32 %v324_v30, %v234_v27  ;;  %v326_v33 = vpop.f32.mrb[1].mxu1  ;;  %v4478_v34 = vpop.f32.mrb[4].mxu0 }
 0x252   :  { %v327_v35 = vadd.f32 %v326_v33, %v238_v28  ;;  %v419_v36 = vadd.f32 %v4478_v34, %v242_v29  ;;  %v413_v38 = vpop.f32.mrb[5].mxu0 }
 0x253   :  { %v455_v39 = vmul.f32 %v439_v31, %v325_v32  ;;  %v414_v40 = vadd.f32 %v413_v38, %v242_v29 }
 0x254   :  { %v330_v41 = vpop.f32.mrb[2].mxu1 }
 0x255   :  { %v5531_v42 = vadd.f32 %v4161_v37, %v455_v39  ;;  %v331_v43 = vadd.f32 %v330_v41, %v234_v27  ;;  %v332_v44 = vpop.f32.mrb[3].mxu1  ;;  %v4481_v45 = vpop.f32.mrb[6].mxu0  ;;  %v5533_v46 = vpack.i.bf16 %v419_v36, %v414_v40  ;;  %v5557_v2 = vpack.c.bf16 %v419_v36, %v414_v40 }
 0x256   :  { %v333_v47 = vadd.f32 %v332_v44, %v238_v28  ;;  %v423_v49 = vpop.f32.mrb[7].mxu0  ;;  %v429_v51 = vadd.f32 %v4481_v45, %v242_v29 }
 0x257   :  { %474 = vrot.lane.b32.xlu1 %v5531_v42, %s5345_s6  ;;  %4486 = vmatprep.mubr.msk.f32.mxu1 %vm678_vm2, %v5531_v42  ;;  %v424_v52 = vadd.f32 %v423_v49, %v242_v29  ;;  %v456_v57 = vmul.f32 %v443_v48, %v331_v43 }
 0x258   :  { %v336_v53 = vpop.f32.mrb[4].mxu1  ;;  %v5545_v54 = vpack.i.bf16 %v333_v47, %v327_v35  ;;  %v4795_v55 = vpack.c.bf16 %v333_v47, %v327_v35 }
 0x259   :  { %v337_v58 = vadd.f32 %v336_v53, %v234_v27  ;;  %v338_v59 = vpop.f32.mrb[5].mxu1  ;;  %v5555_v62 = vpack.i.bf16 %v429_v51, %v424_v52  ;;  %v5559_v8 = vpack.c.bf16 %v429_v51, %v424_v52  ;;  %v467_v12 = vadd.f32 %v4161_v37, %v456_v57 }
 0x25a   :  { %5011 = vrot.lane.b32.xlu0 %v5545_v54, %s5345_s6  ;;  %4797 = vmatprep.subr.msk.bf16.mxu1 %vm5541_vm3, %v4795_v55  ;;  %v339_v60 = vadd.f32 %v338_v59, %v238_v28 }
 0x25b   :  { %4800 = vmatpush3.bf16.xpose.msk.msra.mxu1 %vm5541_vm3, %v4795_v55  ;;  %482 = vrot.lane.b32.xlu1 %v5531_v42, %s5346_s7  ;;  %v457_v61 = vmul.f32 %v450_v56, %v337_v58 }
 0x25c   :  { %v342_v1 = vpop.f32.mrb[6].mxu1 }
 0x25d   :  { %v343_v5 = vadd.f32 %v342_v1, %v234_v27  ;;  %v344_v6 = vpop.f32.mrb[7].mxu1  ;;  %v468_v7 = vadd.f32 %v4161_v37, %v457_v61 }
 0x25e   :  { %v345_v9 = vadd.f32 %v344_v6, %v238_v28  ;;  %5016 = vrot.lane.b32.xlu0 %v5545_v54, %s5346_s7 }
 0x25f   :  { %490 = vrot.lane.b32.xlu1 %v5531_v42, %s5347_s16  ;;  %4493 = vmatprep.mubr.msk.f32.mxu0 %vm678_vm2, %v468_v7  ;;  %v458_v14 = vmul.f32 %v454_v13, %v343_v5 }
 0x260   :  { %v4801_v10 = vpack.c.bf16 %v345_v9, %v339_v60  ;;  %v5035_v11 = vpack.i.bf16 %v345_v9, %v339_v60 }
 0x261   :  { %v469_v15 = vadd.f32 %v4161_v37, %v458_v14 }
 0x262   :  { %4803 = vmatprep.subr.msk.bf16.mxu0 %vm5541_vm3, %v4801_v10  ;;  %5021 = vrot.lane.b32.xlu0 %v5545_v54, %s5347_s16 }
 0x263   :  { %4487 = vmatmul.mubr.msk.f32.vlgmr.msra.gmra.mrb[8].mxu1 %vm678_vm2, %v467_v12  ;;  %4806 = vmatpush3.bf16.xpose.msk.msra.mxu0 %vm5541_vm3, %v4801_v10 }
 0x264   :  { %498 = vrot.lane.b32.xlu1 %v5531_v42, %s5348_s17 }
 0x266   :  { %5026 = vrot.lane.b32.xlu0 %v5545_v54, %s5348_s17 }
 0x268   :  { %5036 = vrot.lane.b32.xlu1 %v5035_v11, %s5345_s6 }
 0x26a   :  { %4494 = vmatmul.mubr.msk.f32.vlgmr.msra.gmra.mrb[8].mxu0 %vm678_vm2, %v469_v15  ;;  %5031 = vrot.lane.b32.xlu0 %v5545_v54, %s5349_s18 }
 0x26c   :  { %5041 = vrot.lane.b32.xlu1 %v5035_v11, %s5346_s7 }
 0x26e   :  { %476 = vrot.lane.b32.xlu0 %v467_v12, %s5345_s6 }
 0x270   :  { %5046 = vrot.lane.b32.xlu1 %v5035_v11, %s5347_s16 }
 0x272   :  { %484 = vrot.lane.b32.xlu0 %v467_v12, %s5346_s7 }
 0x274   :  { %5051 = vrot.lane.b32.xlu1 %v5035_v11, %s5348_s17 }
 0x276   :  { %492 = vrot.lane.b32.xlu0 %v467_v12, %s5347_s16 }
 0x278   :  { %480 = vrot.lane.b32.xlu1 %v469_v15, %s5345_s6 }
 0x27a   :  { %478 = vrot.lane.b32.xlu0 %v468_v7, %s5345_s6 }
 0x27c   :  { %5056 = vrot.lane.b32.xlu1 %v5035_v11, %s5349_s18 }
 0x27e   :  { %500 = vrot.lane.b32.xlu0 %v467_v12, %s5348_s17 }
 0x280   :  { %488 = vrot.lane.b32.xlu1 %v469_v15, %s5346_s7 }
 0x282   :  { %486 = vrot.lane.b32.xlu0 %v468_v7, %s5346_s7 }
 0x284   :  { %506 = vrot.lane.b32.xlu1 %v5531_v42, %s5349_s18 }
 0x286   :  { %494 = vrot.lane.b32.xlu0 %v468_v7, %s5347_s16 }
 0x288   :  { %496 = vrot.lane.b32.xlu1 %v469_v15, %s5347_s16 }
 0x28a   :  { %502 = vrot.lane.b32.xlu0 %v468_v7, %s5348_s17 }
 0x28c   :  { %5066 = vrot.lane.b32.xlu1 %v5035_v11, %s5350_s1 }
 0x28e   :  { %5061 = vrot.lane.b32.xlu0 %v5545_v54, %s5350_s1 }
 0x290   :  { %504 = vrot.lane.b32.xlu1 %v469_v15, %s5348_s17 }
 0x292   :  { %508 = vrot.lane.b32.xlu0 %v467_v12, %s5349_s18 }
 0x294   :  { %514 = vrot.lane.b32.xlu1 %v5531_v42, %s5350_s1 }
 0x296   :  { %510 = vrot.lane.b32.xlu0 %v468_v7, %s5349_s18 }
 0x298   :  { %512 = vrot.lane.b32.xlu1 %v469_v15, %s5349_s18 }
 0x29a   :  { %5071 = vrot.lane.b32.xlu0 %v5545_v54, %s5351_s19 }
 0x29c   :  { %5076 = vrot.lane.b32.xlu1 %v5035_v11, %s5351_s19 }
 0x29e   :  { %516 = vrot.lane.b32.xlu0 %v467_v12, %s5350_s1 }
 0x2a0   :  { %520 = vrot.lane.b32.xlu1 %v469_v15, %s5350_s1 }
 0x2a2   :  { %518 = vrot.lane.b32.xlu0 %v468_v7, %s5350_s1 }
 0x2a4   :  { %524 = vrot.lane.b32.xlu1 %v467_v12, %s5351_s19 }
 0x2a6   :  { %522 = vrot.lane.b32.xlu0 %v5531_v42, %s5351_s19 }
 0x2a8   :  { %528 = vrot.lane.b32.xlu1 %v469_v15, %s5351_s19 }
 0x2aa   :  { %526 = vrot.lane.b32.xlu0 %v468_v7, %s5351_s19 }
 0x2ac   :  { %5081 = vrot.lane.b32.xlu1 %v5533_v46, %s5345_s6 }
 0x2ae   :  { %5091 = vrot.lane.b32.xlu0 %v5533_v46, %s5346_s7 }
 0x2b0   :  { %5086 = vrot.lane.b32.xlu1 %v5555_v62, %s5345_s6 }
 0x2b2   :  { %5101 = vrot.lane.b32.xlu0 %v5533_v46, %s5347_s16 }
 0x2b4   :  { %5096 = vrot.lane.b32.xlu1 %v5555_v62, %s5346_s7 }
 0x2b8   :  { %5106 = vrot.lane.b32.xlu1 %v5555_v62, %s5347_s16 }
 0x2bc   :  { %5111 = vrot.lane.b32.xlu1 %v5533_v46, %s5348_s17 }
 0x2c0   :  { %5116 = vrot.lane.b32.xlu1 %v5555_v62, %s5348_s17 }
 0x2c4   :  { %5121 = vrot.lane.b32.xlu1 %v5533_v46, %s5349_s18 }
 0x2c8   :  { %5126 = vrot.lane.b32.xlu1 %v5555_v62, %s5349_s18 }
 0x2c9   :  { %v475_v16 = vpop.permute.xlu1 %474 }
 0x2ca   :  { %4500 = vmatprep.mubr.msk.f32.mxu1 %vm678_vm2, %v475_v16 }
 0x2cc   :  { %v5012_v17 = vpop.permute.xlu0 %5011 }
 0x2cd   :  { %v5014_v18 = vunpack.i.h.bf16 %v5012_v17  ;;  %v5013_v19 = vunpack.i.l.bf16 %v5012_v17  ;;  %v483_v20 = vpop.permute.xlu1 %482 }
 0x2cf   :  { %v4807_v21 = vpack.c.bf16 %v5014_v18, %v5013_v19 }
 0x2d0   :  { %v5017_v22 = vpop.permute.xlu0 %5016 }
 0x2d1   :  { %v5019_v23 = vunpack.i.h.bf16 %v5017_v22  ;;  %v5018_v25 = vunpack.i.l.bf16 %v5017_v22  ;;  %4809 = vmatprep.subr.msk.bf16.mxu1 %vm5541_vm3, %v4807_v21  ;;  %v491_v26 = vpop.permute.xlu1 %490 }
 0x2d2   :  { %4812 = vmatpush3.bf16.xpose.msk.msra.mxu1 %vm5541_vm3, %v4807_v21 }
 0x2d3   :  { %v4819_v27 = vpack.c.bf16 %v5019_v23, %v5018_v25 }
 0x2d4   :  { %v5022_v28 = vpop.permute.xlu0 %5021 }
 0x2d5   :  { %4821 = vmatprep.subr.msk.bf16.mxu1 %vm5541_vm3, %v4819_v27  ;;  %v5024_v35 = vunpack.i.h.bf16 %v5022_v28  ;;  %v5023_v36 = vunpack.i.l.bf16 %v5022_v28 }
 0x2d6   :  { %v499_v29 = vpop.permute.xlu1 %498 }
 0x2d7   :  { %v4831_v42 = vpack.c.bf16 %v5024_v35, %v5023_v36 }
 0x2d8   :  { %v5027_v30 = vpop.permute.xlu0 %5026 }
 0x2d9   :  { %v5029_v47 = vunpack.i.h.bf16 %v5027_v30  ;;  %v5028_v48 = vunpack.i.l.bf16 %v5027_v30 }
 0x2da   :  { %v5037_v31 = vpop.permute.xlu1 %5036 }
 0x2db   :  { %v5039_v32 = vunpack.i.h.bf16 %v5037_v31  ;;  %v5038_v33 = vunpack.i.l.bf16 %v5037_v31  ;;  %v4843_v52 = vpack.c.bf16 %v5029_v47, %v5028_v48 }
 0x2dc   :  { %v5032_v34 = vpop.permute.xlu0 %5031 }
 0x2dd   :  { %v4813_v37 = vpack.c.bf16 %v5039_v32, %v5038_v33  ;;  %v5034_v57 = vunpack.i.h.bf16 %v5032_v34  ;;  %v5033_v58 = vunpack.i.l.bf16 %v5032_v34 }
 0x2de   :  { %v5042_v38 = vpop.permute.xlu1 %5041 }
 0x2df   :  { %v5044_v39 = vunpack.i.h.bf16 %v5042_v38  ;;  %v5043_v40 = vunpack.i.l.bf16 %v5042_v38  ;;  %4815 = vmatprep.subr.msk.bf16.mxu0 %vm5541_vm3, %v4813_v37  ;;  %v4855_v1 = vpack.c.bf16 %v5034_v57, %v5033_v58 }
 0x2e0   :  { %4818 = vmatpush3.bf16.xpose.msk.msra.mxu0 %vm5541_vm3, %v4813_v37  ;;  %v477_v41 = vpop.permute.xlu0 %476 }
 0x2e1   :  { %v4825_v43 = vpack.c.bf16 %v5044_v39, %v5043_v40  ;;  %4501 = vmatmul.mubr.msk.f32.vlgmr.msra.gmra.mrb[10].mxu1 %vm678_vm2, %v477_v41 }
 0x2e2   :  { %v5047_v44 = vpop.permute.xlu1 %5046  ;;  %4824 = vmatpush3.bf16.xpose.msk.msra.mxu1 %vm5541_vm3, %v4819_v27  ;;  %4514 = vmatprep.mubr.msk.f32.mxu1 %vm678_vm2, %v483_v20 }
 0x2e3   :  { %4827 = vmatprep.subr.msk.bf16.mxu0 %vm5541_vm3, %v4825_v43  ;;  %4833 = vmatprep.subr.msk.bf16.mxu1 %vm5541_vm3, %v4831_v42  ;;  %v5049_v53 = vunpack.i.h.bf16 %v5047_v44  ;;  %v5048_v54 = vunpack.i.l.bf16 %v5047_v44 }
 0x2e4   :  { %v485_v45 = vpop.permute.xlu0 %484 }
 0x2e5   :  { %v4837_v59 = vpack.c.bf16 %v5049_v53, %v5048_v54 }
 0x2e6   :  { %v5052_v49 = vpop.permute.xlu1 %5051 }
 0x2e7   :  { %v5054_v5 = vunpack.i.h.bf16 %v5052_v49  ;;  %v5053_v6 = vunpack.i.l.bf16 %v5052_v49 }
 0x2e8   :  { %v493_v51 = vpop.permute.xlu0 %492 }
 0x2e9   :  { %4515 = vmatmul.mubr.msk.f32.vlgmr.msra.gmra.mrb[12].mxu1 %vm678_vm2, %v485_v45  ;;  %v4849_v10 = vpack.c.bf16 %v5054_v5, %v5053_v6 }
 0x2ea   :  { %v481_v55 = vpop.permute.xlu1 %480  ;;  %4836 = vmatpush3.bf16.xpose.msk.msra.mxu1 %vm5541_vm3, %v4831_v42  ;;  %4528 = vmatprep.mubr.msk.f32.mxu1 %vm678_vm2, %v491_v26 }
 0x2eb   :  { %4845 = vmatprep.subr.msk.bf16.mxu1 %vm5541_vm3, %v4843_v52 }
 0x2ec   :  { %v479_v56 = vpop.permute.xlu0 %478 }
 0x2ed   :  { %4507 = vmatprep.mubr.msk.f32.mxu0 %vm678_vm2, %v479_v56 }
 0x2ee   :  { %v5057_v60 = vpop.permute.xlu1 %5056  ;;  %4508 = vmatmul.mubr.msk.f32.vlgmr.msra.gmra.mrb[10].mxu0 %vm678_vm2, %v481_v55 }
 0x2ef   :  { %4830 = vmatpush3.bf16.xpose.msk.msra.mxu0 %vm5541_vm3, %v4825_v43  ;;  %v5059_v13 = vunpack.i.h.bf16 %v5057_v60  ;;  %v5058_v14 = vunpack.i.l.bf16 %v5057_v60 }
 0x2f0   :  { %4839 = vmatprep.subr.msk.bf16.mxu0 %vm5541_vm3, %v4837_v59  ;;  %v501_v61 = vpop.permute.xlu0 %500 }
 0x2f1   :  { %4529 = vmatmul.mubr.msk.f32.vlgmr.msra.gmra.mrb[14].mxu1 %vm678_vm2, %v493_v51  ;;  %v4861_v17 = vpack.c.bf16 %v5059_v13, %v5058_v14 }
 0x2f2   :  { %v489_v7 = vpop.permute.xlu1 %488  ;;  %4848 = vmatpush3.bf16.xpose.msk.msra.mxu1 %vm5541_vm3, %v4843_v52  ;;  %4542 = vmatprep.mubr.msk.f32.mxu1 %vm678_vm2, %v499_v29 }
 0x2f3   :  { %4857 = vmatprep.subr.msk.bf16.mxu1 %vm5541_vm3, %v4855_v1 }
 0x2f4   :  { %v487_v9 = vpop.permute.xlu0 %486 }
 0x2f5   :  { %4521 = vmatprep.mubr.msk.f32.mxu0 %vm678_vm2, %v487_v9 }
 0x2f6   :  { %v507_v11 = vpop.permute.xlu1 %506  ;;  %4522 = vmatmul.mubr.msk.f32.vlgmr.msra.gmra.mrb[12].mxu0 %vm678_vm2, %v489_v7 }
 0x2f7   :  { %4842 = vmatpush3.bf16.xpose.msk.msra.mxu0 %vm5541_vm3, %v4837_v59 }
 0x2f8   :  { %4851 = vmatprep.subr.msk.bf16.mxu0 %vm5541_vm3, %v4849_v10  ;;  %v495_v12 = vpop.permute.xlu0 %494 }
 0x2f9   :  { %4543 = vmatmul.mubr.msk.f32.vlgmr.msra.gmra.mrb[16].mxu1 %vm678_vm2, %v501_v61  ;;  %4535 = vmatprep.mubr.msk.f32.mxu0 %vm678_vm2, %v495_v12 }
 0x2fa   :  { %v497_v15 = vpop.permute.xlu1 %496  ;;  %4860 = vmatpush3.bf16.xpose.msk.msra.mxu1 %vm5541_vm3, %v4855_v1  ;;  %4556 = vmatprep.mubr.msk.f32.mxu1 %vm678_vm2, %v507_v11 }
 0x2fc   :  { %v503_v16 = vpop.permute.xlu0 %502 }
 0x2fe   :  { %v5067_v18 = vpop.permute.xlu1 %5066  ;;  %4536 = vmatmul.mubr.msk.f32.vlgmr.msra.gmra.mrb[14].mxu0 %vm678_vm2, %v497_v15 }
 0x2ff   :  { %4854 = vmatpush3.bf16.xpose.msk.msra.mxu0 %vm5541_vm3, %v4849_v10  ;;  %4549 = vmatprep.mubr.msk.f32.mxu0 %vm678_vm2, %v503_v16  ;;  %v5069_v22 = vunpack.i.h.bf16 %v5067_v18  ;;  %v5068_v23 = vunpack.i.l.bf16 %v5067_v18 }
 0x300   :  { %4863 = vmatprep.subr.msk.bf16.mxu0 %vm5541_vm3, %v4861_v17  ;;  %v5062_v19 = vpop.permute.xlu0 %5061 }
 0x301   :  { %v5064_v20 = vunpack.i.h.bf16 %v5062_v19  ;;  %v5063_v21 = vunpack.i.l.bf16 %v5062_v19  ;;  %v4873_v28 = vpack.c.bf16 %v5069_v22, %v5068_v23 }
 0x302   :  { %v505_v25 = vpop.permute.xlu1 %504 }
 0x303   :  { %v4867_v26 = vpack.c.bf16 %v5064_v20, %v5063_v21 }
 0x304   :  { %v509_v27 = vpop.permute.xlu0 %508 }
 0x305   :  { %4557 = vmatmul.mubr.msk.f32.vlgmr.msra.gmra.mrb[18].mxu1 %vm678_vm2, %v509_v27  ;;  %4869 = vmatprep.subr.msk.bf16.mxu1 %vm5541_vm3, %v4867_v26 }
 0x306   :  { %v515_v29 = vpop.permute.xlu1 %514  ;;  %4550 = vmatmul.mubr.msk.f32.vlgmr.msra.gmra.mrb[16].mxu0 %vm678_vm2, %v505_v25  ;;  %4872 = vmatpush3.bf16.xpose.msk.msra.mxu1 %vm5541_vm3, %v4867_v26 }
 0x307   :  { %4866 = vmatpush3.bf16.xpose.msk.msra.mxu0 %vm5541_vm3, %v4861_v17  ;;  %4570 = vmatprep.mubr.msk.f32.mxu1 %vm678_vm2, %v515_v29 }
 0x308   :  { %4875 = vmatprep.subr.msk.bf16.mxu0 %vm5541_vm3, %v4873_v28  ;;  %v511_v30 = vpop.permute.xlu0 %510 }
 0x309   :  { %4563 = vmatprep.mubr.msk.f32.mxu0 %vm678_vm2, %v511_v30 }
 0x30a   :  { %v513_v31 = vpop.permute.xlu1 %512 }
 0x30c   :  { %v5072_v32 = vpop.permute.xlu0 %5071 }
 0x30d   :  { %v5074_v33 = vunpack.i.h.bf16 %v5072_v32  ;;  %v5073_v34 = vunpack.i.l.bf16 %v5072_v32 }
 0x30e   :  { %v5077_v35 = vpop.permute.xlu1 %5076  ;;  %4564 = vmatmul.mubr.msk.f32.vlgmr.msra.gmra.mrb[18].mxu0 %vm678_vm2, %v513_v31 }
 0x30f   :  { %v4879_v36 = vpack.c.bf16 %v5074_v33, %v5073_v34  ;;  %v5079_v37 = vunpack.i.h.bf16 %v5077_v35  ;;  %v5078_v38 = vunpack.i.l.bf16 %v5077_v35  ;;  %4878 = vmatpush3.bf16.xpose.msk.msra.mxu0 %vm5541_vm3, %v4873_v28 }
 0x310   :  { %v517_v39 = vpop.permute.xlu0 %516 }
 0x311   :  { %v4885_v40 = vpack.c.bf16 %v5079_v37, %v5078_v38  ;;  %4571 = vmatmul.mubr.msk.f32.vlgmr.msra.gmra.mrb[20].mxu1 %vm678_vm2, %v517_v39  ;;  %4881 = vmatprep.subr.msk.bf16.mxu1 %vm5541_vm3, %v4879_v36 }
 0x312   :  { %v521_v41 = vpop.permute.xlu1 %520  ;;  %4884 = vmatpush3.bf16.xpose.msk.msra.mxu1 %vm5541_vm3, %v4879_v36 }
 0x313   :  { %4887 = vmatprep.subr.msk.bf16.mxu0 %vm5541_vm3, %v4885_v40  ;;  %4892 = vmatprep.subr.bf16.mxu1 %v5557_v2 }
 0x314   :  { %v519_v42 = vpop.permute.xlu0 %518 }
 0x315   :  { %4577 = vmatprep.mubr.msk.f32.mxu0 %vm678_vm2, %v519_v42 }
 0x316   :  { %v525_v43 = vpop.permute.xlu1 %524  ;;  %4578 = vmatmul.mubr.msk.f32.vlgmr.msra.gmra.mrb[20].mxu0 %vm678_vm2, %v521_v41 }
 0x317   :  { %4890 = vmatpush3.bf16.xpose.msk.msra.mxu0 %vm5541_vm3, %v4885_v40 }
 0x318   :  { %v523_v44 = vpop.permute.xlu0 %522 }
 0x319   :  { %4584 = vmatprep.mubr.msk.f32.mxu1 %vm678_vm2, %v523_v44 }
 0x31a   :  { %v529_v45 = vpop.permute.xlu1 %528  ;;  %4585 = vmatmul.mubr.msk.f32.vlgmr.msra.gmra.mrb[22].mxu1 %vm678_vm2, %v525_v43 }
 0x31b   :  { %4894 = vmatpush3.bf16.msra.mxu1 %v5557_v2 }
 0x31c   :  { %4896 = vmatprep.subr.bf16.mxu1 %v5559_v8  ;;  %v527_v47 = vpop.permute.xlu0 %526 }
 0x31d   :  { %4591 = vmatprep.mubr.msk.f32.mxu0 %vm678_vm2, %v527_v47 }
 0x31e   :  { %v5082_v48 = vpop.permute.xlu1 %5081  ;;  %4592 = vmatmul.mubr.msk.f32.vlgmr.msra.gmra.mrb[22].mxu0 %vm678_vm2, %v529_v45 }
 0x31f   :  { %v5084_v49 = vunpack.i.h.bf16 %v5082_v48  ;;  %v5083_v51 = vunpack.i.l.bf16 %v5082_v48 }
 0x320   :  { %v5092_v50 = vpop.permute.xlu0 %5091 }
 0x321   :  { %v5094_v52 = vunpack.i.h.bf16 %v5092_v50  ;;  %v5093_v53 = vunpack.i.l.bf16 %v5092_v50  ;;  %v4899_v54 = vpack.c.bf16 %v5084_v49, %v5083_v51 }
 0x322   :  { %v5744_v5 = vpop.permute.xlu1 %5086 }
 0x323   :  { %4900 = vmatprep.subr.bf16.mxu0 %v4899_v54  ;;  %v5725_v55 = vpack.c.bf16 %v5094_v52, %v5093_v53 }
 0x324   :  { %4902 = vmatpush3.bf16.msra.mxu0 %v4899_v54  ;;  %v5800_v35 = vpop.permute.xlu0 %5101 }
 0x325   :  { %4908 = vmatprep.subr.bf16.mxu0 %v5725_v55 }
 0x326   :  { %v5746_v6 = vpop.permute.xlu1 %5096 }
 0x32a   :  { %v5754_v11 = vpop.permute.xlu1 %5106 }
 0x32e   :  { %v5764_v16 = vpop.permute.xlu1 %5111 }
 0x332   :  { %v5776_v22 = vpop.permute.xlu1 %5116 }
 0x336   :  { %v5728_v2 = vpop.f32.mrb[8].mxu1  ;;  %v5792_v31 = vpop.permute.xlu1 %5121 }
 0x337   :  { %v5730_v56 = vpop.f32.mrb[9].mxu1  ;;  %v2011_v57 = vsel %vm2007_vm4, %v5728_v2, -inf }
 0x338   :  { %2012 = vmax.xlane.f32.xlu1 %v2011_v57  ;;  %v2008_v58 = vsel %vm2007_vm4, %v5730_v56, -inf }
 0x339   :  { %2009 = vmax.xlane.f32.xlu0 %v2008_v58 }
 0x33a   :  { %v5804_v37 = vpop.permute.xlu1 %5126 }
 0x33d   :  { %v5736_v59 = vpop.f32.mrb[8].mxu0 }
 0x33e   :  { %v5738_v60 = vpop.f32.mrb[9].mxu0  ;;  %v2017_v61 = vsel %vm2007_vm4, %v5736_v59, -inf }
 0x33f   :  { %2018 = vmax.xlane.f32.xlu1 %v2017_v61  ;;  %v2014_v1 = vsel %vm2007_vm4, %v5738_v60, -inf }
 0x340   :  { %2015 = vmax.xlane.f32.xlu0 %v2014_v1 }
 0x3b4   :  { %v5748_v7 = vpop.f32.mrb[10].mxu1 }
 0x3b5   :  { %v5750_v9 = vpop.f32.mrb[11].mxu1  ;;  %v2023_v10 = vsel %vm2007_vm4, %v5748_v7, -inf }
 0x3b6   :  { %2024 = vmax.xlane.f32.xlu0 %v2023_v10  ;;  %v2020_v12 = vsel %vm2007_vm4, %v5750_v9, -inf }
 0x3ba   :  { %2021 = vmax.xlane.f32.xlu0 %v2020_v12 }
 0x3bc   :  { %v5758_v13 = vpop.f32.mrb[12].mxu1 }
 0x3bd   :  { %v5760_v14 = vpop.f32.mrb[13].mxu1  ;;  %v2035_v15 = vsel %vm2007_vm4, %v5758_v13, -inf }
 0x3be   :  { %2036 = vmax.xlane.f32.xlu0 %v2035_v15  ;;  %v2032_v18 = vsel %vm2007_vm4, %v5760_v14, -inf }
 0x3c1   :  { %v5766_v17 = vpop.f32.mrb[10].mxu0 }
 0x3c2   :  { %v5770_v19 = vpop.f32.mrb[11].mxu0  ;;  %2033 = vmax.xlane.f32.xlu0 %v2032_v18  ;;  %v2029_v20 = vsel %vm2007_vm4, %v5766_v17, -inf }
 0x3c3   :  { %2030 = vmax.xlane.f32.xlu1 %v2029_v20  ;;  %v2026_v26 = vsel %vm2007_vm4, %v5770_v19, -inf }
 0x3c4   :  { %v5774_v21 = vpop.f32.mrb[14].mxu1 }
 0x3c5   :  { %v5778_v23 = vpop.f32.mrb[15].mxu1  ;;  %v2047_v25 = vsel %vm2007_vm4, %v5774_v21, -inf  ;;  %v2013_v43 = vpop.xlane.xlu1 %2012 }
 0x3c6   :  { %2048 = vmax.xlane.f32.xlu0 %v2047_v25  ;;  %v2044_v28 = vsel %vm2007_vm4, %v5778_v23, -inf  ;;  %v2010_v40 = vpop.xlane.xlu0 %2009  ;;  %v2105_v47 = vsub.f32 %v5728_v2, %v2013_v43 }
 0x3c7   :  { %2027 = vmax.xlane.f32.xlu1 %v2026_v26  ;;  %v2104_v44 = vsub.f32 %v5730_v56, %v2010_v40 }
 0x3c8   :  { %v2138_v56 = vmul.f32 1.442695, %v2105_v47 }
 0x3c9   :  { %v5784_v27 = vpop.f32.mrb[12].mxu0  ;;  %v2136_v49 = vmul.f32 1.442695, %v2104_v44 }
 0x3ca   :  { %v5788_v29 = vpop.f32.mrb[13].mxu0  ;;  %2045 = vmax.xlane.f32.xlu0 %v2044_v28  ;;  %v2041_v30 = vsel %vm2007_vm4, %v5784_v27, -inf }
 0x3cb   :  { %2042 = vmax.xlane.f32.xlu1 %v2041_v30  ;;  %v2038_v36 = vsel %vm2007_vm4, %v5788_v29, -inf  ;;  %5164 = vpow2.f32 %v2136_v49 }
 0x3cc   :  { %v5794_v32 = vpop.f32.mrb[16].mxu1  ;;  %v2019_v57 = vpop.xlane.xlu1 %2018  ;;  %5166 = vpow2.f32 %v2138_v56 }
 0x3cd   :  { %v5796_v33 = vpop.f32.mrb[17].mxu1  ;;  %v2059_v34 = vsel %vm2007_vm4, %v5794_v32, -inf  ;;  %v2107_v61 = vsub.f32 %v5736_v59, %v2019_v57  ;;  %v2016_v10 = vpop.xlane.xlu0 %2015 }
 0x3ce   :  { %2060 = vmax.xlane.f32.xlu0 %v2059_v34  ;;  %v2056_v39 = vsel %vm2007_vm4, %v5796_v33, -inf  ;;  %v2106_v25 = vsub.f32 %v5738_v60, %v2016_v10 }
 0x3cf   :  { %2039 = vmax.xlane.f32.xlu1 %v2038_v36  ;;  %v2142_v20 = vmul.f32 1.442695, %v2107_v61 }
 0x3d0   :  { %v2140_v34 = vmul.f32 1.442695, %v2106_v25 }
 0x3d1   :  { %v5806_v38 = vpop.f32.mrb[14].mxu0  ;;  %5168 = vpow2.f32 %v2142_v20 }
 0x3d2   :  { %v5810_v41 = vpop.f32.mrb[15].mxu0  ;;  %2057 = vmax.xlane.f32.xlu0 %v2056_v39  ;;  %v2053_v42 = vsel %vm2007_vm4, %v5806_v38, -inf  ;;  %5170 = vpow2.f32 %v2140_v34 }
 0x3d3   :  { %2054 = vmax.xlane.f32.xlu1 %v2053_v42  ;;  %v2050_v45 = vsel %vm2007_vm4, %v5810_v41, -inf }
 0x3d5   :  { %v5850_v30 = vpop.eup %5164 }
 0x3d6   :  { %v5856_v60 = vpop.eup %5166  ;;  %v2200_v42 = vsel %vm2007_vm4, %v5850_v30, 0.0 }
 0x3d7   :  { %2051 = vmax.xlane.f32.xlu1 %v2050_v45  ;;  %v2203_v44 = vsel %vm2007_vm4, %v5856_v60, 0.0 }
 0x3d8   :  { %v5818_v48 = vpop.f32.mrb[18].mxu1 }
 0x3d9   :  { %v5820_v51 = vpop.f32.mrb[16].mxu0  ;;  %v5822_v50 = vpop.f32.mrb[19].mxu1  ;;  %v2071_v52 = vsel %vm2007_vm4, %v5818_v48, -inf }
 0x3da   :  { %v5826_v53 = vpop.f32.mrb[17].mxu0  ;;  %2072 = vmax.xlane.f32.xlu0 %v2071_v52  ;;  %v2065_v54 = vsel %vm2007_vm4, %v5820_v51, -inf  ;;  %v2068_v2 = vsel %vm2007_vm4, %v5822_v50, -inf }
 0x3db   :  { %2066 = vmax.xlane.f32.xlu1 %v2065_v54  ;;  %v2062_v58 = vsel %vm2007_vm4, %v5826_v53, -inf }
 0x3de   :  { %2069 = vmax.xlane.f32.xlu0 %v2068_v2  ;;  %v5878_v2 = vpop.eup %5168 }
 0x3df   :  { %2063 = vmax.xlane.f32.xlu1 %v2062_v58  ;;  %v2209_v58 = vsel %vm2007_vm4, %v5878_v2, 0.0  ;;  %v5884_v61 = vpop.eup %5170 }
 0x3e1   :  { %v5835_v1 = vpop.f32.mrb[18].mxu0 }
 0x3e2   :  { %v5837_v12 = vpop.f32.mrb[19].mxu0  ;;  %v2077_v15 = vsel %vm2007_vm4, %v5835_v1, -inf }
 0x3e3   :  { %2078 = vmax.xlane.f32.xlu1 %v2077_v15  ;;  %v2074_v59 = vsel %vm2007_vm4, %v5837_v12, -inf  ;;  %v2206_v15 = vsel %vm2007_vm4, %v5884_v61, 0.0 }
 0x3e4   :  { %v5841_v18 = vpop.f32.mrb[20].mxu1 }
 0x3e5   :  { %v5844_v26 = vpop.f32.mrb[21].mxu1  ;;  %v2083_v28 = vsel %vm2007_vm4, %v5841_v18, -inf }
 0x3e6   :  { %2084 = vmax.xlane.f32.xlu0 %v2083_v28  ;;  %v2080_v39 = vsel %vm2007_vm4, %v5844_v26, -inf }
 0x3e7   :  { %2075 = vmax.xlane.f32.xlu1 %v2074_v59 }
 0x3e9   :  { %v5852_v36 = vpop.f32.mrb[20].mxu0 }
 0x3ea   :  { %v5858_v40 = vpop.f32.mrb[21].mxu0  ;;  %2081 = vmax.xlane.f32.xlu0 %v2080_v39  ;;  %v2089_v47 = vsel %vm2007_vm4, %v5852_v36, -inf }
 0x3eb   :  { %2201 = vadd.xlane.f32.xlu1 %v2200_v42  ;;  %v2086_v56 = vsel %vm2007_vm4, %v5858_v40, -inf }
 0x3ed   :  { %v5862_v43 = vpop.f32.mrb[22].mxu1 }
 0x3ee   :  { %2204 = vadd.xlane.f32.xlu0 %v2203_v44  ;;  %v5866_v45 = vpop.f32.mrb[23].mxu1  ;;  %v2095_v52 = vsel %vm2007_vm4, %v5862_v43, -inf }
 0x3ef   :  { %2090 = vmax.xlane.f32.xlu1 %v2089_v47  ;;  %v2092_v57 = vsel %vm2007_vm4, %v5866_v45, -inf }
 0x3f1   :  { %v5870_v49 = vpop.f32.mrb[22].mxu0 }
 0x3f2   :  { %v5874_v54 = vpop.f32.mrb[23].mxu0  ;;  %2096 = vmax.xlane.f32.xlu0 %v2095_v52  ;;  %v2101_v10 = vsel %vm2007_vm4, %v5870_v49, -inf }
 0x3f3   :  { %2087 = vmax.xlane.f32.xlu1 %v2086_v56  ;;  %v2098_v20 = vsel %vm2007_vm4, %v5874_v54, -inf }
 0x3f6   :  { %2093 = vmax.xlane.f32.xlu0 %v2092_v57 }
 0x3f7   :  { %2210 = vadd.xlane.f32.xlu1 %v2209_v58 }
 0x3fa   :  { %2102 = vmax.xlane.f32.xlu0 %v2101_v10 }
 0x3fb   :  { %2207 = vadd.xlane.f32.xlu1 %v2206_v15 }
 0x3ff   :  { %2099 = vmax.xlane.f32.xlu1 %v2098_v20 }
 0x410   :  { %5136 = vrot.lane.b32.xlu1 %v5555_v62, %s5350_s1  ;;  %5131 = vrot.lane.b32.xlu0 %v5533_v46, %s5350_s1 }
 0x443   :  { %v2025_v25 = vpop.xlane.xlu0 %2024 }
 0x444   :  { %v2109_v28 = vsub.f32 %v5748_v7, %v2025_v25 }
 0x446   :  { %v2146_v59 = vmul.f32 1.442695, %v2109_v28 }
 0x447   :  { %v2022_v34 = vpop.xlane.xlu0 %2021 }
 0x448   :  { %5172 = vpow2.f32 %v2146_v59  ;;  %v2108_v39 = vsub.f32 %v5750_v9, %v2022_v34 }
 0x44a   :  { %v2144_v42 = vmul.f32 1.442695, %v2108_v39 }
 0x44b   :  { %v2037_v44 = vpop.xlane.xlu0 %2036 }
 0x44c   :  { %5174 = vpow2.f32 %v2144_v42  ;;  %v2113_v47 = vsub.f32 %v5758_v13, %v2037_v44 }
 0x44e   :  { %v2154_v52 = vmul.f32 1.442695, %v2113_v47 }
 0x44f   :  { %v2034_v56 = vpop.xlane.xlu0 %2033 }
 0x450   :  { %5176 = vpow2.f32 %v2154_v52  ;;  %v2112_v57 = vsub.f32 %v5760_v14, %v2034_v56  ;;  %v2031_v58 = vpop.xlane.xlu1 %2030 }
 0x451   :  { %v2111_v10 = vsub.f32 %v5766_v17, %v2031_v58 }
 0x452   :  { %v5901_v15 = vpop.eup %5172  ;;  %v2152_v7 = vmul.f32 1.442695, %v2112_v57 }
 0x453   :  { %v2150_v20 = vmul.f32 1.442695, %v2111_v10  ;;  %v2049_v25 = vpop.xlane.xlu0 %2048  ;;  %v2215_v9 = vsel %vm2007_vm4, %v5901_v15, 0.0 }
 0x454   :  { %5178 = vpow2.f32 %v2152_v7  ;;  %v2117_v28 = vsub.f32 %v5774_v21, %v2049_v25  ;;  %v2028_v13 = vpop.xlane.xlu1 %2027  ;;  %2216 = vadd.xlane.f32.xlu0 %v2215_v9 }
 0x455   :  { %5180 = vpow2.f32 %v2150_v20  ;;  %v2110_v59 = vsub.f32 %v5770_v19, %v2028_v13 }
 0x456   :  { %v5907_v14 = vpop.eup %5174  ;;  %v2162_v34 = vmul.f32 1.442695, %v2117_v28 }
 0x457   :  { %v2148_v17 = vmul.f32 1.442695, %v2110_v59  ;;  %v2046_v39 = vpop.xlane.xlu0 %2045  ;;  %v2212_v42 = vsel %vm2007_vm4, %v5907_v14, 0.0 }
 0x458   :  { %5182 = vpow2.f32 %v2162_v34  ;;  %v2116_v44 = vsub.f32 %v5778_v23, %v2046_v39  ;;  %v2043_v47 = vpop.xlane.xlu1 %2042  ;;  %2213 = vadd.xlane.f32.xlu0 %v2212_v42 }
 0x459   :  { %5184 = vpow2.f32 %v2148_v17  ;;  %v2115_v21 = vsub.f32 %v5784_v27, %v2043_v47 }
 0x45a   :  { %v5913_v52 = vpop.eup %5176  ;;  %v2160_v56 = vmul.f32 1.442695, %v2116_v44 }
 0x45b   :  { %v2158_v19 = vmul.f32 1.442695, %v2115_v21  ;;  %v2061_v57 = vpop.xlane.xlu0 %2060  ;;  %v2227_v58 = vsel %vm2007_vm4, %v5913_v52, 0.0 }
 0x45c   :  { %5186 = vpow2.f32 %v2160_v56  ;;  %v2121_v10 = vsub.f32 %v5794_v32, %v2061_v57  ;;  %v2040_v7 = vpop.xlane.xlu1 %2039  ;;  %2228 = vadd.xlane.f32.xlu0 %v2227_v58 }
 0x45d   :  { %5188 = vpow2.f32 %v2158_v19  ;;  %v2114_v23 = vsub.f32 %v5788_v29, %v2040_v7 }
 0x45e   :  { %v5919_v20 = vpop.eup %5178  ;;  %v2170_v25 = vmul.f32 1.442695, %v2121_v10 }
 0x45f   :  { %v5921_v27 = vpop.eup %5180  ;;  %v2156_v9 = vmul.f32 1.442695, %v2114_v23  ;;  %v2058_v28 = vpop.xlane.xlu0 %2057  ;;  %v2224_v13 = vsel %vm2007_vm4, %v5919_v20, 0.0 }
 0x460   :  { %5190 = vpow2.f32 %v2170_v25  ;;  %v2120_v59 = vsub.f32 %v5796_v33, %v2058_v28  ;;  %v2055_v34 = vpop.xlane.xlu1 %2054  ;;  %2225 = vadd.xlane.f32.xlu0 %v2224_v13  ;;  %v2221_v32 = vsel %vm2007_vm4, %v5921_v27, 0.0 }
 0x461   :  { %5192 = vpow2.f32 %v2156_v9  ;;  %v2119_v29 = vsub.f32 %v5806_v38, %v2055_v34  ;;  %2222 = vadd.xlane.f32.xlu1 %v2221_v32 }
 0x462   :  { %v5929_v17 = vpop.eup %5182  ;;  %v2168_v39 = vmul.f32 1.442695, %v2120_v59 }
 0x463   :  { %v5931_v42 = vpop.eup %5184  ;;  %v2166_v44 = vmul.f32 1.442695, %v2119_v29  ;;  %v2239_v47 = vsel %vm2007_vm4, %v5929_v17, 0.0 }
 0x464   :  { %5194 = vpow2.f32 %v2168_v39  ;;  %v2052_v33 = vpop.xlane.xlu1 %2051  ;;  %2240 = vadd.xlane.f32.xlu0 %v2239_v47  ;;  %v2218_v21 = vsel %vm2007_vm4, %v5931_v42, 0.0 }
 0x465   :  { %5196 = vpow2.f32 %v2166_v44  ;;  %v2118_v56 = vsub.f32 %v5810_v41, %v2052_v33  ;;  %2219 = vadd.xlane.f32.xlu1 %v2218_v21 }
 0x466   :  { %v5938_v38 = vpop.eup %5186 }
 0x467   :  { %v5940_v19 = vpop.eup %5188  ;;  %v2164_v57 = vmul.f32 1.442695, %v2118_v56  ;;  %v2073_v58 = vpop.xlane.xlu0 %2072  ;;  %v2236_v10 = vsel %vm2007_vm4, %v5938_v38, 0.0 }
 0x468   :  { %v2125_v7 = vsub.f32 %v5818_v48, %v2073_v58  ;;  %v2067_v23 = vpop.xlane.xlu1 %2066  ;;  %2237 = vadd.xlane.f32.xlu0 %v2236_v10  ;;  %v2233_v25 = vsel %vm2007_vm4, %v5940_v19, 0.0 }
 0x469   :  { %5198 = vpow2.f32 %v2164_v57  ;;  %v2123_v41 = vsub.f32 %v5820_v51, %v2067_v23  ;;  %2234 = vadd.xlane.f32.xlu1 %v2233_v25 }
 0x46a   :  { %v5948_v9 = vpop.eup %5190  ;;  %v2178_v28 = vmul.f32 1.442695, %v2125_v7 }
 0x46b   :  { %v5950_v13 = vpop.eup %5192  ;;  %v2174_v59 = vmul.f32 1.442695, %v2123_v41  ;;  %v2070_v34 = vpop.xlane.xlu0 %2069  ;;  %v2251_v32 = vsel %vm2007_vm4, %v5948_v9, 0.0 }
 0x46c   :  { %5200 = vpow2.f32 %v2178_v28  ;;  %v2124_v48 = vsub.f32 %v5822_v50, %v2070_v34  ;;  %v2064_v29 = vpop.xlane.xlu1 %2063  ;;  %2252 = vadd.xlane.f32.xlu0 %v2251_v32  ;;  %v2230_v39 = vsel %vm2007_vm4, %v5950_v13, 0.0 }
 0x46d   :  { %5202 = vpow2.f32 %v2174_v59  ;;  %v2122_v51 = vsub.f32 %v5826_v53, %v2064_v29  ;;  %2231 = vadd.xlane.f32.xlu1 %v2230_v39 }
 0x46e   :  { %v5958_v44 = vpop.eup %5194  ;;  %v2176_v47 = vmul.f32 1.442695, %v2124_v48 }
 0x46f   :  { %v5960_v33 = vpop.eup %5196  ;;  %v2172_v21 = vmul.f32 1.442695, %v2122_v51  ;;  %v2248_v56 = vsel %vm2007_vm4, %v5958_v44, 0.0 }
 0x470   :  { %5204 = vpow2.f32 %v2176_v47  ;;  %v2079_v50 = vpop.xlane.xlu1 %2078  ;;  %2249 = vadd.xlane.f32.xlu0 %v2248_v56  ;;  %v2245_v57 = vsel %vm2007_vm4, %v5960_v33, 0.0 }
 0x471   :  { %5206 = vpow2.f32 %v2172_v21  ;;  %v2127_v58 = vsub.f32 %v5835_v1, %v2079_v50  ;;  %2246 = vadd.xlane.f32.xlu1 %v2245_v57 }
 0x473   :  { %v5967_v53 = vpop.eup %5198  ;;  %v2182_v10 = vmul.f32 1.442695, %v2127_v58  ;;  %v2085_v7 = vpop.xlane.xlu0 %2084 }
 0x474   :  { %v2129_v23 = vsub.f32 %v5841_v18, %v2085_v7  ;;  %v2076_v25 = vpop.xlane.xlu1 %2075  ;;  %v2242_v41 = vsel %vm2007_vm4, %v5967_v53, 0.0 }
 0x475   :  { %5208 = vpow2.f32 %v2182_v10  ;;  %v2126_v28 = vsub.f32 %v5837_v12, %v2076_v25  ;;  %2243 = vadd.xlane.f32.xlu1 %v2242_v41 }
 0x476   :  { %v5973_v59 = vpop.eup %5200  ;;  %v2186_v34 = vmul.f32 1.442695, %v2129_v23 }
 0x477   :  { %v5975_v32 = vpop.eup %5202  ;;  %v2180_v1 = vmul.f32 1.442695, %v2126_v28  ;;  %v2082_v48 = vpop.xlane.xlu0 %2081  ;;  %v2263_v29 = vsel %vm2007_vm4, %v5973_v59, 0.0 }
 0x478   :  { %5210 = vpow2.f32 %v2186_v34  ;;  %v2128_v18 = vsub.f32 %v5844_v26, %v2082_v48  ;;  %v2202_v39 = vpop.xlane.xlu1 %2201  ;;  %2264 = vadd.xlane.f32.xlu0 %v2263_v29  ;;  %v2257_v51 = vsel %vm2007_vm4, %v5975_v32, 0.0 }
 0x479   :  { %5212 = vpow2.f32 %v2180_v1  ;;  %2258 = vadd.xlane.f32.xlu1 %v2257_v51 }
 0x47a   :  { %v5982_v12 = vpop.eup %5204  ;;  %v2184_v47 = vmul.f32 1.442695, %v2128_v18  ;;  %5214 = vrcp.f32 %v2202_v39 }
 0x47b   :  { %v5984_v21 = vpop.eup %5206  ;;  %v2205_v56 = vpop.xlane.xlu0 %2204  ;;  %v2260_v50 = vsel %vm2007_vm4, %v5982_v12, 0.0 }
 0x47c   :  { %5216 = vpow2.f32 %v2184_v47  ;;  %v2091_v57 = vpop.xlane.xlu1 %2090  ;;  %2261 = vadd.xlane.f32.xlu0 %v2260_v50  ;;  %v2254_v26 = vsel %vm2007_vm4, %v5984_v21, 0.0 }
 0x47d   :  { %5218 = vrcp.f32 %v2205_v56  ;;  %v2131_v58 = vsub.f32 %v5852_v36, %v2091_v57  ;;  %2255 = vadd.xlane.f32.xlu1 %v2254_v26  ;;  %v5089_v57 = vunpack.i.h.bf16 %v5744_v5  ;;  %v5088_v26 = vunpack.i.l.bf16 %v5744_v5 }
 0x47f   :  { %v5991_v10 = vpop.eup %5208  ;;  %v2190_v7 = vmul.f32 1.442695, %v2131_v58  ;;  %v2097_v23 = vpop.xlane.xlu0 %2096  ;;  %v4903_v5 = vpack.c.bf16 %v5089_v57, %v5088_v26 }
 0x480   :  { %v2133_v25 = vsub.f32 %v5862_v43, %v2097_v23  ;;  %v2088_v41 = vpop.xlane.xlu1 %2087  ;;  %v2269_v28 = vsel %vm2007_vm4, %v5991_v10, 0.0 }
 0x481   :  { %5220 = vpow2.f32 %v2190_v7  ;;  %v2130_v34 = vsub.f32 %v5858_v40, %v2088_v41  ;;  %2270 = vadd.xlane.f32.xlu1 %v2269_v28 }
 0x482   :  { %v5997_v1 = vpop.eup %5210  ;;  %v2194_v48 = vmul.f32 1.442695, %v2133_v25 }
 0x483   :  { %v5999_v29 = vpop.eup %5212  ;;  %v2188_v36 = vmul.f32 1.442695, %v2130_v34  ;;  %v2094_v18 = vpop.xlane.xlu0 %2093  ;;  %v2275_v39 = vsel %vm2007_vm4, %v5997_v1, 0.0 }
 0x484   :  { %v5215_v51 = vpop.eup %5214  ;;  %5222 = vpow2.f32 %v2194_v48  ;;  %v2132_v43 = vsub.f32 %v5866_v45, %v2094_v18  ;;  %v2211_v47 = vpop.xlane.xlu1 %2210  ;;  %2276 = vadd.xlane.f32.xlu0 %v2275_v39  ;;  %v2266_v40 = vsel %vm2007_vm4, %v5999_v29, 0.0 }
 0x485   :  { %2267 = vadd.xlane.f32.xlu1 %v2266_v40  ;;  %v2328_v56 = vmul.f32 %v5215_v51, %v5850_v30  ;;  %5224 = vpow2.f32 %v2188_v36  ;;  %v5098_v40 = vunpack.i.l.bf16 %v5746_v6 }
 0x486   :  { %v6007_v50 = vpop.eup %5216  ;;  %v2192_v7 = vmul.f32 1.442695, %v2132_v43  ;;  %5226 = vrcp.f32 %v2211_v47  ;;  %v5099_v47 = vunpack.i.h.bf16 %v5746_v6 }
 0x487   :  { %v5219_v58 = vpop.eup %5218  ;;  %4598 = vmatprep.mubr.msk.f32.mxu1 %vm2007_vm4, %v2328_v56  ;;  %v2103_v45 = vpop.xlane.xlu0 %2102  ;;  %v2272_v23 = vsel %vm2007_vm4, %v6007_v50, 0.0 }
 0x488   :  { %v2329_v25 = vmul.f32 %v5219_v58, %v5856_v60  ;;  %v2135_v30 = vsub.f32 %v5870_v49, %v2103_v45  ;;  %v2208_v41 = vpop.xlane.xlu1 %2207  ;;  %2273 = vadd.xlane.f32.xlu0 %v2272_v23  ;;  %v6039_v58 = vpack.c.bf16 %v5099_v47, %v5098_v40 }
 0x489   :  { %5228 = vrcp.f32 %v2208_v41 }
 0x48a   :  { %4599 = vmatmul.mubr.msk.f32.vlgmr.msra.gmra.mrb[24].mxu1 %vm2007_vm4, %v2329_v25  ;;  %5230 = vpow2.f32 %v2192_v7  ;;  %v2198_v34 = vmul.f32 1.442695, %v2135_v30 }
 0x48b   :  { %v6017_v28 = vpop.eup %5220  ;;  %4898 = vmatpush3.bf16.msra.mxu1 %v5559_v8  ;;  %v6056_v23 = vpop.permute.xlu0 %5131 }
 0x48c   :  { %4904 = vmatprep.subr.bf16.mxu1 %v4903_v5  ;;  %v2100_v48 = vpop.xlane.xlu1 %2099  ;;  %v2281_v60 = vsel %vm2007_vm4, %v6017_v28, 0.0  ;;  %5232 = vpow2.f32 %v2198_v34 }
 0x48d   :  { %v2134_v36 = vsub.f32 %v5874_v54, %v2100_v48  ;;  %2282 = vadd.xlane.f32.xlu0 %v2281_v60 }
 0x48e   :  { %v6023_v49 = vpop.eup %5222 }
 0x48f   :  { %v2196_v18 = vmul.f32 1.442695, %v2134_v36  ;;  %v2287_v39 = vsel %vm2007_vm4, %v6023_v49, 0.0  ;;  %v6027_v51 = vpop.eup %5224 }
 0x490   :  { %v5227_v8 = vpop.eup %5226  ;;  %v2278_v54 = vsel %vm2007_vm4, %v6027_v51, 0.0 }
 0x491   :  { %5234 = vpow2.f32 %v2196_v18  ;;  %2288 = vadd.xlane.f32.xlu0 %v2287_v39  ;;  %v2331_v26 = vmul.f32 %v5227_v8, %v5878_v2  ;;  %v5103_v18 = vunpack.i.l.bf16 %v5800_v35 }
 0x493   :  { %v5229_v43 = vpop.eup %5228 }
 0x494   :  { %v2330_v56 = vmul.f32 %v5229_v43, %v5884_v61  ;;  %v6034_v57 = vpop.eup %5230 }
 0x495   :  { %2279 = vadd.xlane.f32.xlu0 %v2278_v54  ;;  %v2284_v6 = vsel %vm2007_vm4, %v6034_v57, 0.0 }
 0x496   :  { %4605 = vmatprep.mubr.msk.f32.mxu1 %vm2007_vm4, %v2330_v56  ;;  %v6043_v7 = vpop.eup %5232 }
 0x497   :  { %4606 = vmatmul.mubr.msk.f32.vlgmr.msra.gmra.mrb[26].mxu1 %vm2007_vm4, %v2331_v26  ;;  %v2293_v45 = vsel %vm2007_vm4, %v6043_v7, 0.0 }
 0x498   :  { %4906 = vmatpush3.bf16.msra.mxu1 %v4903_v5  ;;  %v6058_v5 = vpop.permute.xlu1 %5136 }
 0x499   :  { %4912 = vmatprep.subr.bf16.mxu1 %v6039_v58  ;;  %2285 = vadd.xlane.f32.xlu0 %v2284_v6 }
 0x49b   :  { %v6046_v61 = vpop.eup %5234 }
 0x49c   :  { %v2290_v2 = vsel %vm2007_vm4, %v6046_v61, 0.0 }
 0x49d   :  { %2291 = vadd.xlane.f32.xlu1 %v2290_v2  ;;  %2294 = vadd.xlane.f32.xlu0 %v2293_v45 }
 0x4ae   :  { %5146 = vrot.lane.b32.xlu1 %v5555_v62, %s5351_s19  ;;  %v5104_v62 = vunpack.i.h.bf16 %v5800_v35 }
 0x4b0   :  { %v4915_v47 = vpack.c.bf16 %v5104_v62, %v5103_v18  ;;  %v5124_v62 = vunpack.i.h.bf16 %v5792_v31  ;;  %v5123_v18 = vunpack.i.l.bf16 %v5792_v31 }
 0x4b2   :  { %v4931_v31 = vpack.c.bf16 %v5124_v62, %v5123_v18 }
 0x4b3   :  { %5141 = vrot.lane.b32.xlu0 %v5533_v46, %s5351_s19 }
 0x4e1   :  { %v2217_v25 = vpop.xlane.xlu0 %2216 }
 0x4e2   :  { %5236 = vrcp.f32 %v2217_v25 }
 0x4e5   :  { %v2214_v30 = vpop.xlane.xlu0 %2213 }
 0x4e6   :  { %5238 = vrcp.f32 %v2214_v30 }
 0x4e9   :  { %v2229_v41 = vpop.xlane.xlu0 %2228 }
 0x4ea   :  { %5240 = vrcp.f32 %v2229_v41  ;;  %v5109_v41 = vunpack.i.h.bf16 %v5754_v11 }
 0x4ec   :  { %v5237_v60 = vpop.eup %5236 }
 0x4ed   :  { %v2226_v34 = vpop.xlane.xlu0 %2225  ;;  %v2333_v8 = vmul.f32 %v5237_v60, %v5901_v15  ;;  %v5113_v15 = vunpack.i.l.bf16 %v5764_v16 }
 0x4ee   :  { %5242 = vrcp.f32 %v2226_v34  ;;  %v2223_v48 = vpop.xlane.xlu1 %2222  ;;  %v5108_v34 = vunpack.i.l.bf16 %v5754_v11 }
 0x4ef   :  { %5244 = vrcp.f32 %v2223_v48 }
 0x4f0   :  { %v5239_v36 = vpop.eup %5238  ;;  %v4919_v11 = vpack.c.bf16 %v5109_v41, %v5108_v34 }
 0x4f1   :  { %v2241_v46 = vpop.xlane.xlu0 %2240  ;;  %v2332_v39 = vmul.f32 %v5239_v36, %v5907_v14  ;;  %v5114_v14 = vunpack.i.h.bf16 %v5764_v16 }
 0x4f2   :  { %v2220_v43 = vpop.xlane.xlu1 %2219 }
 0x4f3   :  { %5246 = vrcp.f32 %v2220_v43  ;;  %4612 = vmatprep.mubr.msk.f32.mxu0 %vm2007_vm4, %v2332_v39  ;;  %v4923_v25 = vpack.c.bf16 %v5114_v14, %v5113_v15  ;;  %v5119_v43 = vunpack.i.h.bf16 %v5776_v22  ;;  %v5133_v14 = vunpack.i.l.bf16 %v6056_v23 }
 0x4f4   :  { %4613 = vmatmul.mubr.msk.f32.vlgmr.msra.gmra.mrb[24].mxu0 %vm2007_vm4, %v2333_v8  ;;  %5248 = vrcp.f32 %v2241_v46  ;;  %v5241_v54 = vpop.eup %5240 }
 0x4f5   :  { %4910 = vmatpush3.bf16.msra.mxu0 %v5725_v55  ;;  %v2238_v40 = vpop.xlane.xlu0 %2237  ;;  %v2337_v2 = vmul.f32 %v5241_v54, %v5913_v52 }
 0x4f6   :  { %4916 = vmatprep.subr.bf16.mxu0 %v4915_v47  ;;  %5250 = vrcp.f32 %v2238_v40  ;;  %v2235_v35 = vpop.xlane.xlu1 %2234 }
 0x4f7   :  { %5252 = vrcp.f32 %v2235_v35 }
 0x4f8   :  { %v5243_v56 = vpop.eup %5242 }
 0x4f9   :  { %v2253_v26 = vpop.xlane.xlu0 %2252  ;;  %v2336_v6 = vmul.f32 %v5243_v56, %v5919_v20  ;;  %v5245_v55 = vpop.eup %5244  ;;  %v5134_v56 = vunpack.i.h.bf16 %v6056_v23 }
 0x4fa   :  { %v2232_v45 = vpop.xlane.xlu1 %2231  ;;  %v2335_v60 = vmul.f32 %v5245_v55, %v5921_v27  ;;  %v5128_v55 = vunpack.i.l.bf16 %v5804_v37 }
 0x4fb   :  { %5254 = vrcp.f32 %v2232_v45  ;;  %4626 = vmatprep.mubr.msk.f32.mxu0 %vm2007_vm4, %v2336_v6  ;;  %v4939_v6 = vpack.c.bf16 %v5134_v56, %v5133_v14  ;;  %v5129_v45 = vunpack.i.h.bf16 %v5804_v37 }
 0x4fc   :  { %4627 = vmatmul.mubr.msk.f32.vlgmr.msra.gmra.mrb[26].mxu0 %vm2007_vm4, %v2337_v2  ;;  %5256 = vrcp.f32 %v2253_v26 }
 0x4fd   :  { %v5247_v30 = vpop.eup %5246  ;;  %4918 = vmatpush3.bf16.msra.mxu0 %v4915_v47  ;;  %v2250_v16 = vpop.xlane.xlu0 %2249  ;;  %v5118_v47 = vunpack.i.l.bf16 %v5776_v22  ;;  %v4935_v41 = vpack.c.bf16 %v5129_v45, %v5128_v55 }
 0x4fe   :  { %4924 = vmatprep.subr.bf16.mxu0 %v4923_v25  ;;  %5258 = vrcp.f32 %v2250_v16  ;;  %v2247_v52 = vpop.xlane.xlu1 %2246  ;;  %v2334_v20 = vmul.f32 %v5247_v30, %v5931_v42  ;;  %v5249_v48 = vpop.eup %5248 }
 0x4ff   :  { %v2341_v39 = vmul.f32 %v5249_v48, %v5929_v17  ;;  %5260 = vrcp.f32 %v2247_v52  ;;  %v4927_v15 = vpack.c.bf16 %v5119_v43, %v5118_v47  ;;  %v5139_v48 = vunpack.i.h.bf16 %v6058_v5 }
 0x500   :  { %v5251_v36 = vpop.eup %5250  ;;  %4619 = vmatprep.mubr.msk.f32.mxu1 %vm2007_vm4, %v2334_v20 }
 0x501   :  { %4620 = vmatmul.mubr.msk.f32.vlgmr.msra.gmra.mrb[28].mxu1 %vm2007_vm4, %v2335_v60  ;;  %v2340_v46 = vmul.f32 %v5251_v36, %v5938_v38  ;;  %v5253_v27 = vpop.eup %5252 }
 0x502   :  { %4914 = vmatpush3.bf16.msra.mxu1 %v6039_v58  ;;  %v2244_v42 = vpop.xlane.xlu1 %2243  ;;  %v2339_v35 = vmul.f32 %v5253_v27, %v5940_v19 }
 0x503   :  { %5262 = vrcp.f32 %v2244_v42  ;;  %4920 = vmatprep.subr.bf16.mxu1 %v4919_v11  ;;  %4640 = vmatprep.mubr.msk.f32.mxu0 %vm2007_vm4, %v2340_v46 }
 0x504   :  { %4641 = vmatmul.mubr.msk.f32.vlgmr.msra.gmra.mrb[28].mxu0 %vm2007_vm4, %v2341_v39 }
 0x505   :  { %v5255_v8 = vpop.eup %5254  ;;  %4926 = vmatpush3.bf16.msra.mxu0 %v4923_v25  ;;  %v2265_v38 = vpop.xlane.xlu0 %2264 }
 0x506   :  { %4932 = vmatprep.subr.bf16.mxu0 %v4931_v31  ;;  %v2259_v17 = vpop.xlane.xlu1 %2258  ;;  %v2338_v58 = vmul.f32 %v5255_v8, %v5950_v13  ;;  %v5257_v40 = vpop.eup %5256  ;;  %5264 = vrcp.f32 %v2265_v38 }
 0x507   :  { %5266 = vrcp.f32 %v2259_v17  ;;  %v2345_v13 = vmul.f32 %v5257_v40, %v5948_v9 }
 0x508   :  { %v5259_v54 = vpop.eup %5258  ;;  %4633 = vmatprep.mubr.msk.f32.mxu1 %vm2007_vm4, %v2338_v58 }
 0x509   :  { %4634 = vmatmul.mubr.msk.f32.vlgmr.msra.gmra.mrb[30].mxu1 %vm2007_vm4, %v2339_v35  ;;  %v2262_v22 = vpop.xlane.xlu0 %2261  ;;  %v2344_v26 = vmul.f32 %v5259_v54, %v5958_v44  ;;  %v5261_v23 = vpop.eup %5260 }
 0x50a   :  { %4922 = vmatpush3.bf16.msra.mxu1 %v4919_v11  ;;  %5268 = vrcp.f32 %v2262_v22  ;;  %v2256_v19 = vpop.xlane.xlu1 %2255  ;;  %v2343_v25 = vmul.f32 %v5261_v23, %v5960_v33 }
 0x50b   :  { %5270 = vrcp.f32 %v2256_v19  ;;  %4928 = vmatprep.subr.bf16.mxu1 %v4927_v15  ;;  %4654 = vmatprep.mubr.msk.f32.mxu0 %vm2007_vm4, %v2344_v26 }
 0x50c   :  { %4655 = vmatmul.mubr.msk.f32.vlgmr.msra.gmra.mrb[30].mxu0 %vm2007_vm4, %v2345_v13 }
 0x50d   :  { %v5263_v2 = vpop.eup %5262  ;;  %4934 = vmatpush3.bf16.msra.mxu0 %v4931_v31 }
 0x50e   :  { %4940 = vmatprep.subr.bf16.mxu0 %v4939_v6  ;;  %v2271_v44 = vpop.xlane.xlu1 %2270  ;;  %v2342_v9 = vmul.f32 %v5263_v2, %v5967_v53  ;;  %v5138_v53 = vunpack.i.l.bf16 %v6058_v5  ;;  %v5352_v2 = vmov 0.0|0.0  }
 0x50f   :  { %5272 = vrcp.f32 %v2271_v44  ;;  %v3915_v44 = vld [vmem:[%s6284_s8 + $0x10] sm:$0xff] }
 0x510   :  { %4647 = vmatprep.mubr.msk.f32.mxu1 %vm2007_vm4, %v2342_v9  ;;  %v5265_v34 = vpop.eup %5264  ;;  %v4943_v11 = vpack.c.bf16 %v5139_v48, %v5138_v53  ;;  %v3916_v9 = vld [vmem:[%s6284_s8 + $0x18] sm:$0xff] }
 0x511   :  { %4648 = vmatmul.mubr.msk.f32.vlgmr.msra.gmra.mrb[32].mxu1 %vm2007_vm4, %v2343_v25  ;;  %v2277_v30 = vpop.xlane.xlu0 %2276  ;;  %v5267_v52 = vpop.eup %5266  ;;  %v2349_v36 = vmul.f32 %v5265_v34, %v5973_v59 }
 0x512   :  { %4930 = vmatpush3.bf16.msra.mxu1 %v4927_v15  ;;  %v2268_v16 = vpop.xlane.xlu1 %2267  ;;  %v2347_v18 = vmul.f32 %v5267_v52, %v5975_v32 }
 0x513   :  { %5274 = vrcp.f32 %v2268_v16  ;;  %4936 = vmatprep.subr.bf16.mxu1 %v4935_v41 }
 0x514   :  { %v5269_v37 = vpop.eup %5268  ;;  %5276 = vrcp.f32 %v2277_v30  ;;  %v3919_v30 = vld [vmem:[%s6284_s8 + $0x30] sm:$0xff] }
 0x515   :  { %v5271_v20 = vpop.eup %5270  ;;  %v2274_v33 = vpop.xlane.xlu0 %2273  ;;  %v2348_v60 = vmul.f32 %v5269_v37, %v5982_v12 }
 0x516   :  { %5278 = vrcp.f32 %v2274_v33  ;;  %v2346_v62 = vmul.f32 %v5271_v20, %v5984_v21 }
 0x517   :  { %4668 = vmatprep.mubr.msk.f32.mxu0 %vm2007_vm4, %v2348_v60 }
 0x518   :  { %4661 = vmatprep.mubr.msk.f32.mxu1 %vm2007_vm4, %v2346_v62  ;;  %4669 = vmatmul.mubr.msk.f32.vlgmr.msra.gmra.mrb[32].mxu0 %vm2007_vm4, %v2349_v36 }
 0x519   :  { %4942 = vmatpush3.bf16.msra.mxu0 %v4939_v6  ;;  %4662 = vmatmul.mubr.msk.f32.vlgmr.msra.gmra.mrb[34].mxu1 %vm2007_vm4, %v2347_v18  ;;  %v5273_v12 = vpop.eup %5272 }
 0x51a   :  { %4938 = vmatpush3.bf16.msra.mxu1 %v4935_v41  ;;  %v2283_v5 = vpop.xlane.xlu0 %2282  ;;  %v2351_v32 = vmul.f32 %v5273_v12, %v5991_v10 }
 0x51b   :  { %4944 = vmatprep.subr.bf16.mxu1 %v4943_v11  ;;  %5280 = vrcp.f32 %v2283_v5 }
 0x51d   :  { %v5275_v59 = vpop.eup %5274 }
 0x51e   :  { %v2289_v46 = vpop.xlane.xlu0 %2288  ;;  %v2350_v21 = vmul.f32 %v5275_v59, %v5999_v29  ;;  %v5277_v39 = vpop.eup %5276 }
 0x51f   :  { %v2353_v31 = vmul.f32 %v5277_v39, %v5997_v1 }
 0x520   :  { %v5279_v42 = vpop.eup %5278  ;;  %4675 = vmatprep.mubr.msk.f32.mxu1 %vm2007_vm4, %v2350_v21 }
 0x521   :  { %4676 = vmatmul.mubr.msk.f32.vlgmr.msra.gmra.mrb[36].mxu1 %vm2007_vm4, %v2351_v32  ;;  %v2352_v27 = vmul.f32 %v5279_v42, %v6007_v50 }
 0x522   :  { %4946 = vmatpush3.bf16.msra.mxu1 %v4943_v11  ;;  %v2280_v8 = vpop.xlane.xlu0 %2279 }
 0x523   :  { %5282 = vrcp.f32 %v2280_v8  ;;  %4682 = vmatprep.mubr.msk.f32.mxu0 %vm2007_vm4, %v2352_v27  ;;  %v3801_v27 = vld [vmem:[%s6286_s10] sm:$0xff]  ;;  %v3803_v8 = vld [vmem:[%s6286_s10 + $0x10] sm:$0xff] }
 0x524   :  { %4683 = vmatmul.mubr.msk.f32.vlgmr.msra.gmra.mrb[34].mxu0 %vm2007_vm4, %v2353_v31  ;;  %v3802_v31 = vld [vmem:[%s6286_s10 + $0x8] sm:$0xff] }
 0x525   :  { %v5281_v47 = vpop.eup %5280 }
 0x526   :  { %v2286_v29 = vpop.xlane.xlu0 %2285  ;;  %v2355_v50 = vmul.f32 %v5281_v47, %v6017_v28  ;;  %v3913_v28 = vld [vmem:[%s6284_s8] sm:$0xff] }
 0x527   :  { %5284 = vrcp.f32 %v2286_v29  ;;  %v4955_v29 = vpack.c.bf16 %v3802_v31, %v3801_v27  ;;  %v3805_v47 = vld [vmem:[%s6286_s10 + $0x20] sm:$0xff] }
 0x528   :  { %5286 = vrcp.f32 %v2289_v46 }
 0x52a   :  { %v2292_v10 = vpop.xlane.xlu1 %2291  ;;  %v2295_v43 = vpop.xlane.xlu0 %2294 }
 0x52b   :  { %5288 = vrcp.f32 %v2292_v10  ;;  %v3804_v10 = vld [vmem:[%s6286_s10 + $0x18] sm:$0xff] }
 0x52c   :  { %5290 = vrcp.f32 %v2295_v43  ;;  %v4959_v43 = vpack.c.bf16 %v3804_v10, %v3803_v8 }
 0x52d   :  { %v5283_v38 = vpop.eup %5282 }
 0x52e   :  { %v5147_v17 = vpop.permute.xlu1 %5146  ;;  %v5142_v1 = vpop.permute.xlu0 %5141  ;;  %v2354_v58 = vmul.f32 %v5283_v38, %v6027_v51  ;;  %v3914_v51 = vld [vmem:[%s6284_s8 + $0x8] sm:$0xff] }
 0x52f   :  { %v5149_v40 = vunpack.i.h.bf16 %v5147_v17  ;;  %v5148_v35 = vunpack.i.l.bf16 %v5147_v17  ;;  %v5144_v54 = vunpack.i.h.bf16 %v5142_v1  ;;  %v5143_v56 = vunpack.i.l.bf16 %v5142_v1  ;;  %v3806_v38 = vld [vmem:[%s6286_s10 + $0x28] sm:$0xff] }
 0x530   :  { %4689 = vmatprep.mubr.msk.f32.mxu1 %vm2007_vm4, %v2354_v58  ;;  %v4972_v45 = vpack.c.bf16 %v3914_v51, %v3913_v28  ;;  %v4963_v1 = vpack.c.bf16 %v3806_v38, %v3805_v47  ;;  %v3807_v58 = vld [vmem:[%s6286_s10 + $0x30] sm:$0xff] }
 0x531   :  { %v5285_v14 = vpop.eup %5284  ;;  %v4951_v22 = vpack.c.bf16 %v5149_v40, %v5148_v35  ;;  %v4947_v15 = vpack.c.bf16 %v5144_v54, %v5143_v56  ;;  %4690 = vmatmul.mubr.msk.f32.vlgmr.msra.gmra.mrb[38].mxu1 %vm2007_vm4, %v2355_v50  ;;  %v3808_v40 = vld [vmem:[%s6286_s10 + $0x38] sm:$0xff] }
 0x532   :  { %v5287_v26 = vpop.eup %5286  ;;  %v2356_v13 = vmul.f32 %v5285_v14, %v6034_v57  ;;  %v4967_v56 = vpack.c.bf16 %v3808_v40, %v3807_v58 }
 0x533   :  { %4948 = vmatprep.subr.bf16.mxu0 %v4947_v15  ;;  %4952 = vmatprep.subr.bf16.mxu1 %v4951_v22  ;;  %v2357_v23 = vmul.f32 %v5287_v26, %v6023_v49  ;;  %v4975_v49 = vpack.c.bf16 %v3916_v9, %v3915_v44 }
 0x534   :  { %4950 = vmatpush3.bf16.msra.mxu0 %v4947_v15  ;;  %4696 = vmatprep.mubr.msk.f32.mxu0 %vm2007_vm4, %v2356_v13 }
 0x535   :  { %v5289_v19 = vpop.eup %5288  ;;  %4954 = vmatpush3.bf16.msra.mxu1 %v4951_v22  ;;  %4956 = vmatprep.subr.bf16.mxu0 %v4955_v29 }
 0x536   :  { %v5291_v6 = vpop.eup %5290  ;;  %v2358_v57 = vmul.f32 %v5289_v19, %v6046_v61  ;;  %4971 = vmatprep.subr.bf16.mxu1 %v5352_v2  ;;  %v3918_v61 = vld [vmem:[%s6284_s8 + $0x28] sm:$0xff] }
 0x537   :  { %v2359_v55 = vmul.f32 %v5291_v6, %v6043_v7  ;;  %4697 = vmatmul.mubr.msk.f32.vlgmr.msra.gmra.mrb[36].mxu0 %vm2007_vm4, %v2357_v23  ;;  %v3917_v7 = vld [vmem:[%s6284_s8 + $0x20] sm:$0xff] }
 0x538   :  { %4703 = vmatprep.mubr.msk.f32.mxu1 %vm2007_vm4, %v2358_v57  ;;  %v4978_v25 = vpack.c.bf16 %v3918_v61, %v3917_v7  ;;  %4958 = vmatpush3.bf16.msra.mxu0 %v4955_v29 }
 0x539   :  { %4704 = vmatmul.mubr.msk.f32.vlgmr.msra.gmra.mrb[40].mxu1 %vm2007_vm4, %v2359_v55  ;;  %4960 = vmatprep.subr.bf16.mxu0 %v4959_v43 }
 0x53a   :  { %4973 = vmatpush3.bf16.msra.mxu1 %v4972_v45  ;;  %4744 = vmatprep.mubr.msk.f32.mxu1 %vm5353_vm5, %v5344_v63  ;;  %v3920_v63 = vld [vmem:[%s6284_s8 + $0x38] sm:$0xff]  ;;  %s5355_s8 = smov 16  }
 0x53b   :  { %4974 = vmatprep.subr.bf16.mxu1 %v5352_v2  ;;  %v4981_v41 = vpack.c.bf16 %v3920_v63, %v3919_v30 }
 0x53c   :  { %4962 = vmatpush3.bf16.msra.mxu0 %v4959_v43 }
 0x53d   :  { %4964 = vmatprep.subr.bf16.mxu0 %v4963_v1 }
 0x53e   :  { %4976 = vmatpush3.bf16.msra.mxu1 %v4975_v49 }
 0x53f   :  { %4977 = vmatprep.subr.bf16.mxu1 %v5352_v2 }
 0x540   :  { %4966 = vmatpush3.bf16.msra.mxu0 %v4963_v1 }
 0x541   :  { %4968 = vmatprep.subr.bf16.mxu0 %v4967_v56 }
 0x542   :  { %4979 = vmatpush3.bf16.msra.mxu1 %v4978_v25 }
 0x543   :  { %4980 = vmatprep.subr.bf16.mxu1 %v5352_v2 }
 0x544   :  { %4970 = vmatpush3.bf16.msra.mxu0 %v4967_v56 }
 0x546   :  { %4982 = vmatpush3.bf16.msra.mxu1 %v4981_v41 }
 0x549   :  { %4745 = vmatmul.mubr.msk.f32.vlgmr.msra.gmra.mrb[42].mxu1 %vm103_vm0, %v5519_v24 }
 0x55d   :  { %v6161_v34 = vpop.f32.mrb[24].mxu1 }
 0x55e   :  { %v6163_v16 = vpop.f32.mrb[25].mxu1 }
 0x56a   :  { %v6165_v52 = vpop.f32.mrb[26].mxu1 }
 0x56b   :  { %v6167_v37 = vpop.f32.mrb[27].mxu1 }
 0x5c7   :  { %v4614_v20 = vpop.f32.mrb[24].mxu0 }
 0x5c8   :  { %3662 = vrot.lane.b32.xlu1 %v4614_v20, %s5354_s13  ;;  %v2594_v48 = vpop.f32.mrb[25].mxu0 }
 0x5c9   :  { %3660 = vrot.lane.b32.xlu0 %v2594_v48, %s5354_s13 }
 0x5cf   :  { %v4628_v53 = vpop.f32.mrb[26].mxu0 }
 0x5d0   :  { %3678 = vrot.lane.b32.xlu1 %v4628_v53, %s5355_s8  ;;  %v2756_v33 = vpop.f32.mrb[27].mxu0 }
 0x5d4   :  { %v4621_v60 = vpop.f32.mrb[28].mxu1 }
 0x5d5   :  { %v2675_v36 = vpop.f32.mrb[29].mxu1  ;;  %3666 = vrot.lane.b32.xlu0 %v4621_v60, %s5354_s13 }
 0x5d6   :  { %3664 = vrot.lane.b32.xlu1 %v2675_v36, %s5354_s13  ;;  %s4139_s13 = sshll.u32 %s5364_s4, 4  ;;  %s4140_s13 = int_to_ptr.vmem [resolvable:$true] %s4139_s13 }
 0x5d7   :  { %v4642_v24 = vpop.f32.mrb[28].mxu0  ;;  %p5319_p9 = scmp.lt.s32.totalorder %s4140_s13, %s4140_s13 }
 0x5d8   :  { %v2918_v62 = vpop.f32.mrb[29].mxu0 }
 0x5d9   :  { %3676 = vrot.lane.b32.xlu0 %v2756_v33, %s5355_s8 }
 0x5da   :  { %3694 = vrot.lane.b32.xlu1 %v4642_v24, %s5342_s14 }
 0x5dc   :  { %v4635_v18 = vpop.f32.mrb[30].mxu1 }
 0x5dd   :  { %v2837_v11 = vpop.f32.mrb[31].mxu1  ;;  %3682 = vrot.lane.b32.xlu0 %v4635_v18, %s5355_s8 }
 0x5de   :  { %3680 = vrot.lane.b32.xlu1 %v2837_v11, %s5355_s8  ;;  %s5314_s8 = scalar_lea.vmem %s4140_s13, 32 }
 0x5df   :  { %v4656_v5 = vpop.f32.mrb[30].mxu0  ;;  %p5315_p8 = scmp.ne.s32.totalorder %s4140_s13, %s5314_s8  ;;  %p5320_p10 = scmp.lt.s32.totalorder %s5314_s8, %s5314_s8 }
 0x5e0   :  { %v3080_v12 = vpop.f32.mrb[31].mxu0 }
 0x5e1   :  { %3692 = vrot.lane.b32.xlu0 %v2918_v62, %s5342_s14  ;;  %p5321_p11 = por %p5320_p10, %p5319_p9 }
 0x5e3   :  { %p5322_p12 = pnand %p5321_p11, %p5315_p8 }
 0x5e4   :  { %v4649_v59 = vpop.f32.mrb[32].mxu1 }
 0x5e5   :  { %v2999_v46 = vpop.f32.mrb[33].mxu1  ;;  %3710 = vrot.lane.b32.xlu0 %v4656_v5, %s5356_s15 }
 0x5e6   :  { %3696 = vrot.lane.b32.xlu1 %v2999_v46, %s5342_s14 }
 0x5e9   :  { %3698 = vrot.lane.b32.xlu0 %v4649_v59, %s5342_s14  ;;  %s5357_s14 = smov 40  }
 0x5eb   :  { %v4670_v21 = vpop.f32.mrb[32].mxu0 }
 0x5ec   :  { %v4663_v39 = vpop.f32.mrb[34].mxu1  ;;  %v3242_v32 = vpop.f32.mrb[33].mxu0 }
 0x5ed   :  { %v3161_v42 = vpop.f32.mrb[35].mxu1  ;;  %3714 = vrot.lane.b32.xlu1 %v4663_v39, %s5356_s15  ;;  %3708 = vrot.lane.b32.xlu0 %v3080_v12, %s5356_s15 }
 0x5f1   :  { %3726 = vrot.lane.b32.xlu0 %v4670_v21, %s5357_s14  ;;  %3724 = vrot.lane.b32.xlu1 %v3242_v32, %s5357_s14 }
 0x5f4   :  { %v4677_v50 = vpop.f32.mrb[36].mxu1 }
 0x5f5   :  { %v3323_v17 = vpop.f32.mrb[37].mxu1  ;;  %3712 = vrot.lane.b32.xlu1 %v3161_v42, %s5356_s15 }
 0x5f7   :  { %v4684_v35 = vpop.f32.mrb[34].mxu0 }
 0x5f8   :  { %3742 = vrot.lane.b32.xlu0 %v4684_v35, %s5358_s27  ;;  %v3404_v54 = vpop.f32.mrb[35].mxu0 }
 0x5f9   :  { %3730 = vrot.lane.b32.xlu1 %v4677_v50, %s5357_s14 }
 0x5fc   :  { %3728 = vrot.lane.b32.xlu0 %v3323_v17, %s5357_s14 }
 0x5fd   :  { %3740 = vrot.lane.b32.xlu1 %v3404_v54, %s5358_s27 }
 0x604   :  { %v4691_v14 = vpop.f32.mrb[38].mxu1 }
 0x605   :  { %v3485_v22 = vpop.f32.mrb[39].mxu1 }
 0x60a   :  { %v4698_v15 = vpop.f32.mrb[36].mxu0 }
 0x60b   :  { %3758 = vrot.lane.b32.xlu0 %v4698_v15, %s5359_s0  ;;  %v3566_v26 = vpop.f32.mrb[37].mxu0 }
 0x60c   :  { %v4705_v13 = vpop.f32.mrb[40].mxu1  ;;  %3756 = vrot.lane.b32.xlu1 %v3566_v26, %s5359_s0  ;;  %v4258_v26 = vld [vmem:[%s6287_s11] ss:$0 sm:$0xff] }
 0x60d   :  { %v3647_v28 = vpop.f32.mrb[41].mxu1 }
 0x60f   :  { %3744 = vrot.lane.b32.xlu0 %v3485_v22, %s5358_s27 }
 0x610   :  { %3746 = vrot.lane.b32.xlu1 %v4691_v14, %s5358_s27 }
 0x613   :  { %3760 = vrot.lane.b32.xlu0 %v3647_v28, %s5359_s0 }
 0x614   :  { %3762 = vrot.lane.b32.xlu1 %v4705_v13, %s5359_s0 }
 0x61c   :  { %v6201_v51 = vpop.f32.mrb[42].mxu1 }
 0x61d   :  { %v4746_v19 = vpop.f32.mrb[43].mxu1 }
 0x63a   :  { %v3663_v6 = vpop.permute.xlu1 %3662 }
 0x63b   :  { %v3661_v23 = vpop.permute.xlu0 %3660  ;;  %v3769_v62 = vsel %vm678_vm2, %v6161_v34, %v3663_v6  ;;  %v5360_v6 = vmov 1  }
 0x63c   :  { %v3768_v36 = vsel %vm678_vm2, %v6163_v16, %v3661_v23 }
 0x642   :  { %v3679_v2 = vpop.permute.xlu1 %3678 }
 0x643   :  { %v3773_v5 = vsel %vm2007_vm4, %v3769_v62, %v3679_v2 }
 0x647   :  { %v3667_v57 = vpop.permute.xlu0 %3666 }
 0x648   :  { %v3665_v55 = vpop.permute.xlu1 %3664  ;;  %v3771_v10 = vsel %vm678_vm2, %v6165_v52, %v3667_v57 }
 0x649   :  { %v3770_v8 = vsel %vm678_vm2, %v6167_v37, %v3665_v55 }
 0x64b   :  { %v3677_v45 = vpop.permute.xlu0 %3676 }
 0x64c   :  { %v3695_v9 = vpop.permute.xlu1 %3694  ;;  %v3772_v18 = vsel %vm2007_vm4, %v3768_v36, %v3677_v45 }
 0x64d   :  { %v3778_v59 = vsel %vm3776_vm6, %v3773_v5, %v3695_v9 }
 0x64f   :  { %v3683_v44 = vpop.permute.xlu0 %3682 }
 0x650   :  { %v3681_v7 = vpop.permute.xlu1 %3680  ;;  %v3775_v38 = vsel %vm2007_vm4, %v3771_v10, %v3683_v44  ;;  %v4025_v44 = vand.u32 127, %v231_v3 }
 0x651   :  { %v3774_v43 = vsel %vm2007_vm4, %v3770_v8, %v3681_v7 }
 0x652   :  { %v4030_v7 = vadd.s32 4294967288, %v4025_v44 }
 0x653   :  { %v3693_v49 = vpop.permute.xlu0 %3692 }
 0x654   :  { %v3777_v12 = vsel %vm3776_vm6, %v3772_v18, %v3693_v49 }
 0x657   :  { %v3711_v61 = vpop.permute.xlu0 %3710 }
 0x658   :  { %v3697_v25 = vpop.permute.xlu1 %3696  ;;  %v3783_v16 = vsel %vm3781_vm7, %v3778_v59, %v3711_v61 }
 0x659   :  { %v3779_v50 = vsel %vm3776_vm6, %v3774_v43, %v3697_v25  ;;  %v4033_v25 = vsub.s32 %v4030_v7, %v5500_v4 }
 0x65b   :  { %v3699_v63 = vpop.permute.xlu0 %3698 }
 0x65c   :  { %v3780_v1 = vsel %vm3776_vm6, %v3775_v38, %v3699_v63  ;;  %v4263_v38 = vld [vmem:[%s6285_s9] ss:$0 sm:$0xff]  ;;  %s5363_s9 = smov 34  }
 0x65f   :  { %v3715_v30 = vpop.permute.xlu1 %3714  ;;  %v3709_v20 = vpop.permute.xlu0 %3708 }
 0x660   :  { %v3782_v46 = vsel %vm3781_vm7, %v3777_v12, %v3709_v20  ;;  %v3785_v58 = vsel %vm3781_vm7, %v3780_v1, %v3715_v30  ;;  %v4028_v30 = vsub.s32 %v4025_v44, %v5500_v4  ;;  %v4097_v20 = vadd.s32 4294967280, %v4025_v44 }
 0x663   :  { %v3725_v41 = vpop.permute.xlu1 %3724  ;;  %v3727_v53 = vpop.permute.xlu0 %3726 }
 0x664   :  { %v3787_v21 = vsel %vm3786_vm8, %v3782_v46, %v3725_v41  ;;  %v3788_v39 = vsel %vm3786_vm8, %v3783_v16, %v3727_v53  ;;  %v4102_v41 = vadd.s32 4294967272, %v4025_v44 }
 0x667   :  { %v3713_v48 = vpop.permute.xlu1 %3712 }
 0x668   :  { %v3784_v37 = vsel %vm3781_vm7, %v3779_v50, %v3713_v48  ;;  %v4000_v50 = vadd.f32 %v4263_v38, %v6201_v51 }
 0x66a   :  { %v3743_v33 = vpop.permute.xlu0 %3742 }
 0x66b   :  { %v3731_v60 = vpop.permute.xlu1 %3730  ;;  %v3793_v27 = vsel %vm3791_vm9, %v3788_v39, %v3743_v33  ;;  %v4105_v33 = vsub.s32 %v4102_v41, %v5500_v4 }
 0x66c   :  { %v3790_v52 = vsel %vm3786_vm8, %v3785_v58, %v3731_v60  ;;  %v4100_v60 = vsub.s32 %v4097_v20, %v5500_v4 }
 0x66e   :  { %v3729_v24 = vpop.permute.xlu0 %3728 }
 0x66f   :  { %v3741_v11 = vpop.permute.xlu1 %3740  ;;  %v3789_v40 = vsel %vm3786_vm8, %v3784_v37, %v3729_v24 }
 0x670   :  { %v3792_v32 = vsel %vm3791_vm9, %v3787_v21, %v3741_v11 }
 0x67d   :  { %v3759_v34 = vpop.permute.xlu0 %3758 }
 0x67e   :  { %v3757_v42 = vpop.permute.xlu1 %3756  ;;  %v3798_v29 = vsel %vm3796_vm10, %v3793_v27, %v3759_v34 }
 0x67f   :  { %v3797_v31 = vsel %vm3796_vm10, %v3792_v32, %v3757_v42 }
 0x680   :  { %4722 = vmatprep.mubr.msk.f32.mxu0 %vm103_vm0, %v3797_v31 }
 0x681   :  { %v3745_v47 = vpop.permute.xlu0 %3744  ;;  %4723 = vmatmul.mubr.msk.f32.vlgmr.msra.gmra.mrb[38].mxu0 %vm103_vm0, %v3798_v29 }
 0x682   :  { %v3747_v17 = vpop.permute.xlu1 %3746  ;;  %v3794_v35 = vsel %vm3791_vm9, %v3789_v40, %v3745_v47 }
 0x683   :  { %v3795_v56 = vsel %vm3791_vm9, %v3790_v52, %v3747_v17 }
 0x685   :  { %v3761_v54 = vpop.permute.xlu0 %3760 }
 0x686   :  { %v3799_v14 = vsel %vm3796_vm10, %v3794_v35, %v3761_v54  ;;  %v3763_v22 = vpop.permute.xlu1 %3762 }
 0x687   :  { %v3800_v15 = vsel %vm3796_vm10, %v3795_v56, %v3763_v22  ;;  %4725 = vmatprep.mubr.msk.f32.mxu0 %vm103_vm0, %v3799_v14 }
 0x688   :  { %4726 = vmatmul.mubr.msk.f32.gmra.mrb[40].mxu0 %vm103_vm0, %v3800_v15  ;;  %vm4131_vm0 = vcmask 288024  }
 0x754   :  { %v4724_v13 = vpop.f32.mrb[38].mxu0 }
 0x755   :  { %v3900_v28 = vadd.f32 %v4724_v13, %v4258_v26  ;;  %v3894_v19 = vpop.f32.mrb[39].mxu0 }
 0x756   :  { %v3895_v23 = vadd.f32 %v4258_v26, %v3894_v19 }
 0x757   :  { %4016 = vperm.xlu1 %5009, %v3900_v28  }
 0x758   :  { %4013 = vperm.xlu0 %5008, %v3895_v23  }
 0x75b   :  { %5150 = vset.pattern.permute.xlu1 %v5360_v6  ;;  %v4727_v57 = vpop.f32.mrb[40].mxu0 }
 0x75c   :  { %4056 = vperm.xlu1 %5150, %v3900_v28   ;;  %5151 = vset.pattern.permute.xlu0 %v5360_v6  ;;  %v3904_v2 = vpop.f32.mrb[41].mxu0  ;;  %v3910_v45 = vadd.f32 %v4727_v57, %v4258_v26 }
 0x75d   :  { %4053 = vperm.xlu0 %5151, %v3895_v23   ;;  %v3905_v55 = vadd.f32 %v4258_v26, %v3904_v2 }
 0x760   :  { %5152 = vset.pattern.permute.xlu1 %v5343_v0 }
 0x761   :  { %5153 = vset.pattern.permute.xlu0 %v5343_v0  ;;  %4022 = vperm.xlu1 %5152, %v3910_v45  }
 0x762   :  { %4019 = vperm.xlu0 %5153, %v3905_v55  }
 0x765   :  { %5154 = vset.pattern.permute.xlu1 %v5360_v6 }
 0x766   :  { %4059 = vperm.xlu1 %5154, %v3905_v55   ;;  %5155 = vset.pattern.permute.xlu0 %v5360_v6 }
 0x767   :  { %4062 = vperm.xlu0 %5155, %v3910_v45  }
 0x7d6   :  { %v4017_v9 = vpop.permute.xlu1 %4016 }
 0x7d7   :  { %v4014_v49 = vpop.permute.xlu0 %4013  ;;  %v4034_v0 = vrot.slane %v4017_v9, %v4033_v25 }
 0x7d8   :  { %v4029_v48 = vrot.slane %v4014_v49, %v4028_v30 }
 0x7da   :  { %v4036_v18 = vsel %vm4035_vm11, %v4034_v0, %v4029_v48 }
 0x7db   :  { %v4057_v61 = vpop.permute.xlu1 %4056 }
 0x7dc   :  { %v4054_v63 = vpop.permute.xlu0 %4053  ;;  %v4071_v62 = vrot.slane %v4057_v61, %v4033_v25  ;;  %v4106_v5 = vrot.slane %v4057_v61, %v4105_v33 }
 0x7dd   :  { %v4067_v12 = vrot.slane %v4054_v63, %v4028_v30  ;;  %v4101_v59 = vrot.slane %v4054_v63, %v4100_v60 }
 0x7df   :  { %v4108_v27 = vsel %vm4107_vm13, %v4106_v5, %v4101_v59  ;;  %v4072_v8 = vsel %vm4035_vm11, %v4071_v62, %v4067_v12 }
 0x7e0   :  { %v4023_v53 = vpop.permute.xlu1 %4022 }
 0x7e1   :  { %v4044_v36 = vrot.slane %v4023_v53, %v4033_v25  ;;  %v4020_v3 = vpop.permute.xlu0 %4019 }
 0x7e2   :  { %v4040_v24 = vrot.slane %v4020_v3, %v4028_v30 }
 0x7e4   :  { %v4045_v11 = vsel %vm4035_vm11, %v4044_v36, %v4040_v24 }
 0x7e5   :  { %v4060_v46 = vpop.permute.xlu1 %4059  ;;  %v4046_v16 = vsel %vm3929_vm1, %v4045_v11, %v4036_v18 }
 0x7e6   :  { %v4076_v21 = vrot.slane %v4060_v46, %v4028_v30  ;;  %v4112_v34 = vrot.slane %v4060_v46, %v4100_v60  ;;  %v4063_v4 = vpop.permute.xlu0 %4062  ;;  %v4049_v39 = vsel %vm4048_vm12, %v4046_v16, -inf  ;;  %4096 = vst.msk [vmem:[#allocation5] sm:$0x3] %vm4048_vm12, %v4046_v16 }
 0x7e7   :  { %v4080_v32 = vrot.slane %v4063_v4, %v4033_v25  ;;  %v4116_v42 = vrot.slane %v4063_v4, %v4105_v33  ;;  %4050 = vmax.xlane.f32.xlu1 %v4049_v39 }
 0x7e9   :  { %v4117_v31 = vsel %vm4107_vm13, %v4116_v42, %v4112_v34  ;;  %v4081_v29 = vsel %vm4035_vm11, %v4080_v32, %v4076_v21 }
 0x7ea   :  { %v4118_v10 = vsel %vm3929_vm1, %v4117_v31, %v4108_v27  ;;  %v4082_v43 = vsel %vm3929_vm1, %v4081_v29, %v4072_v8 }
 0x7eb   :  { %v4084_v47 = vsel %vm4048_vm12, %v4082_v43, -inf  ;;  %4121 = vst.msk [vmem:[#allocation5] sm:$0x3] %vm4120_vm14, %v4118_v10 }
 0x7ec   :  { %4085 = vmax.xlane.f32.xlu0 %v4084_v47 }
 0x7f8   :  { %4091 = vrot.lane.b32.xlu1 %v4000_v50, %s5361_s30 }
 0x7fc   :  { %4122 = vrot.lane.b32.xlu1 %v4000_v50, %s5356_s15 }
 0x802   :  { %4004 = vrot.lane.b32.xlu0 %v4000_v50, %s5362_s2 }
 0x874   :  { %v4051_v17 = vpop.xlane.xlu1 %4050 }
 0x878   :  { %v4092_v1 = vpop.permute.xlu1 %4091 }
 0x879   :  { %v4086_v37 = vpop.xlane.xlu0 %4085 }
 0x87a   :  { %v4087_v58 = vadd.f32 %v4086_v37, %v4051_v17 }
 0x87c   :  { %v4123_v40 = vpop.permute.xlu1 %4122  ;;  %v4089_v54 = vmul.f32 0.5, %v4087_v58 }
 0x87d   :  { %4126 = vst.msk [vmem:[#allocation5] sm:$0x3] %vm4125_vm15, %v4123_v40  ;;  %v4005_v52 = vpop.permute.xlu0 %4004 }
 0x87e   :  { %v4007_v35 = vsub.f32 %v4000_v50, %v4005_v52 }
 0x880   :  { %v4088_v56 = vmul.f32 0.5, %v4007_v35 }
 0x882   :  { %v4090_v14 = vadd.f32 %v4089_v54, %v4088_v56 }
 0x884   :  { %v4094_v22 = vadd.f32 %v4092_v1, %v4090_v14 }
 0x886   :  { %4128 = vrot.lane.b32.xlu0 %v4094_v22, %s5363_s9 }
 0x8f8   :  { %v4129_v51 = vpop.permute.xlu0 %4128 }
 0x8f9   :  { %4132 = vst.msk [vmem:[#allocation5] sm:$0x3] %vm4131_vm0, %v4129_v51 }
 0x8fa   :  { %5325 = shalt.err (!%p5322_p12)
}
 0x8fb   :  { %s5326_s7 = scalar_lea.hbm %s6288_s12, 32 }
 0x8fc   :  { %p5327_p13 = scmp.ne.s32.totalorder %s6288_s12, %s5326_s7  ;;  %p5330_p0 = scmp.lt.u32.totalorder %s5326_s7, %s6288_s12 }
 0x8fe   :  { %p5332_p1 = pnand %p5330_p0, %p5327_p13 }
 0x900   :  { %5335 = shalt.err (!%p5332_p1)
}
 0x901   :  { %4142 = dma.vmem_to_hbm [thread:$0]  %s4140_s13, 32, %s6288_s12, [#allocation4]  }
 0x902   :  { %5338 = dma.done.wait [#allocation4], 32  }
 0x903   :  { %5339 = vsyncadd [#allocation4], 4294967264 }
 0x904   :  { %4146 = vsyncpa [#allocation3], 1 }
 0x905   :  { %4147 = vsyncpa [#allocation4], 1 }

</bundles_post_ra>
